<compile_context>
chip_gen: v5e
topology: v5e:2x2
jax: 0.10.0
libtpu: 0.0.40
codegen_flags: <defaults>
</compile_context>

<pallas_src>
import functools

import jax
import jax.numpy as jnp
from jax.experimental import pallas as pl
from jax.experimental.pallas import tpu as pltpu

IN_DIM = 28 * 28          # 784
K_PAD = 896               # 7 * 128  (lane-aligned K for the first matmul)
HID = 512
OUT_DIM = 10
OUT_PAD = 128             # lane-dense output width; real logits are [:, :10]

# Batch tile.  256 fills the 2x256x256 MXU on v6e/v7x.
# TODO(synk): on v5e (4x128x128 MXU) TM=128 is the better default.
DEFAULT_TM = 256


def _round_up(x, m):
    return (x + m - 1) // m * m


def mlp_kernel(x_ref, w1_ref, b1_ref, w2_ref, b2_ref, w3_ref, b3_ref, o_ref):
    # bf16 operands on the MXU, f32 accumulation; bias + ReLU in f32 on the VPU.
    x = x_ref[...].astype(jnp.bfloat16)

    h1 = jnp.dot(x, w1_ref[...], preferred_element_type=jnp.float32)
    h1 = jnp.maximum(h1 + b1_ref[...], 0.0)

    h2 = jnp.dot(h1.astype(jnp.bfloat16), w2_ref[...],
                 preferred_element_type=jnp.float32)
    h2 = jnp.maximum(h2 + b2_ref[...], 0.0)

    logits = jnp.dot(h2.astype(jnp.bfloat16), w3_ref[...],
                     preferred_element_type=jnp.float32)
    o_ref[...] = (logits + b3_ref[...]).astype(o_ref.dtype)


@functools.partial(jax.jit, static_argnames=("tm",))
def neural_network_forward(x_nchw, params, *, tm=DEFAULT_TM):
    """x_nchw: (B, 1, 28, 28) float32.  Returns logits (B, 10) float32.

    `params` are the padded/bf16 kernel params from prepare_params().
    """
    w1, b1, w2, b2, w3, b3 = params
    B = x_nchw.shape[0]

    # nn.Flatten(): (B, C, H, W) -> (B, C*H*W), row-major (glue stays in JAX).
    x = x_nchw.reshape(B, -1)

    # Pad K to a lane multiple (784 -> 896) and the batch to a tile multiple.
    tm_eff = min(tm, _round_up(B, 8))
    b_pad = _round_up(B, tm_eff)
    x = jnp.pad(x, ((0, b_pad - B), (0, K_PAD - IN_DIM)))

    grid = (b_pad // tm_eff,)
    const = lambda i: (0, 0)          # weights/biases: resident across grid steps

    out_padded = pl.pallas_call(
        mlp_kernel,
        out_shape=jax.ShapeDtypeStruct((b_pad, OUT_PAD), jnp.float32),
        grid=grid,
        in_specs=[
            pl.BlockSpec((tm_eff, K_PAD), lambda i: (i, 0)),   # x tile (streamed)
            pl.BlockSpec((K_PAD, HID), const),                 # w1
            pl.BlockSpec((1, HID), const),                     # b1
            pl.BlockSpec((HID, HID), const),                   # w2
            pl.BlockSpec((1, HID), const),                     # b2
            pl.BlockSpec((HID, OUT_PAD), const),               # w3 (N padded to 128)
            pl.BlockSpec((1, OUT_PAD), const),                 # b3 (padded)
        ],
        out_specs=pl.BlockSpec((tm_eff, OUT_PAD), lambda i: (i, 0)),
        compiler_params=pltpu.CompilerParams(
            dimension_semantics=("parallel",)),
    )(x, w1, b1, w2, b2, w3, b3)

    return out_padded[:B, :OUT_DIM]


def init_params(key):
    """Deterministic init matching the PyTorch module's parameter shapes.
    PyTorch Linear weight is (out, in); we store the transpose (in, out).
    Returned params are unpadded float32 (the "logical" parameters)."""
    k1, k2, k3, k4, k5, k6 = jax.random.split(key, 6)

    def uniform_fan_in(k, shape, fan_in):
        bound = 1.0 / jnp.sqrt(fan_in)
        return jax.random.uniform(k, shape, jnp.float32, -bound, bound)

    w1 = uniform_fan_in(k1, (IN_DIM, HID), IN_DIM)
    b1 = uniform_fan_in(k2, (1, HID), IN_DIM)
    w2 = uniform_fan_in(k3, (HID, HID), HID)
    b2 = uniform_fan_in(k4, (1, HID), HID)
    w3 = uniform_fan_in(k5, (HID, OUT_DIM), HID)
    b3 = uniform_fan_in(k6, (1, OUT_DIM), HID)
    return (w1, b1, w2, b2, w3, b3)


def prepare_params(params):
    """Pad K (784->896) and the last layer's N (10->128), cast weights to bf16."""
    w1, b1, w2, b2, w3, b3 = params
    w1p = jnp.pad(w1, ((0, K_PAD - IN_DIM), (0, 0))).astype(jnp.bfloat16)
    w2p = w2.astype(jnp.bfloat16)
    w3p = jnp.pad(w3, ((0, 0), (0, OUT_PAD - OUT_DIM))).astype(jnp.bfloat16)
    b3p = jnp.pad(b3, ((0, 0), (0, OUT_PAD - OUT_DIM)))
    return (w1p, b1, w2p, b2, w3p, b3p)


def reference_forward(x_nchw, params):
    """Pure-JAX reference emulating the kernel numerics (bf16 matmuls, f32 accum)."""
    w1, b1, w2, b2, w3, b3 = params
    x = x_nchw.reshape(x_nchw.shape[0], -1)

    def mm(a, w):
        return jnp.dot(a.astype(jnp.bfloat16), w.astype(jnp.bfloat16),
                       preferred_element_type=jnp.float32)

    h1 = jnp.maximum(mm(x, w1) + b1, 0.0)
    h2 = jnp.maximum(mm(h1, w2) + b2, 0.0)
    return mm(h2, w3) + b3


if __name__ == "__main__":
    key = jax.random.PRNGKey(0)
    kp, kx = jax.random.split(key)
    logical_params = init_params(kp)
    kernel_params = prepare_params(logical_params)

    # Small batch of MNIST-shaped inputs, NCHW like PyTorch.
    x = jax.random.normal(kx, (8, 1, 28, 28), dtype=jnp.float32)

    logits = neural_network_forward(x, kernel_params)
    logits = jax.block_until_ready(logits)

    ref = reference_forward(x, logical_params)
    assert logits.shape == (8, 10)
    assert jnp.allclose(logits, ref, atol=2e-2, rtol=2e-2), (
        float(jnp.max(jnp.abs(logits - ref))))

    print("KERNEL_OK")
</pallas_src>

<mosaic_0001>
module attributes {stable_mosaic.version = 11 : i64} {
  func.func @mlp_kernel(%arg0: i32, %arg1: memref<8x896xf32, #tpu.memory_space<vmem>>, %arg2: memref<896x512xbf16, #tpu.memory_space<vmem>>, %arg3: memref<1x512xf32, #tpu.memory_space<vmem>>, %arg4: memref<512x512xbf16, #tpu.memory_space<vmem>>, %arg5: memref<1x512xf32, #tpu.memory_space<vmem>>, %arg6: memref<512x128xbf16, #tpu.memory_space<vmem>>, %arg7: memref<1x128xf32, #tpu.memory_space<vmem>>, %arg8: memref<8x128xf32, #tpu.memory_space<vmem>>) attributes {dimension_semantics = [#tpu.dimension_semantics<parallel>], iteration_bounds = array<i64: 1>, scalar_prefetch = 0 : i64, scratch_operands = 0 : i64, tpu.core_type = #tpu.core_type<tc>, window_params = [{transform_indices = @transform_0, window_bounds = array<i64: 8, 896>}, {pipeline_mode = #tpu.pipeline_mode<synchronous>, transform_indices = @transform_1, window_bounds = array<i64: 896, 512>}, {pipeline_mode = #tpu.pipeline_mode<synchronous>, transform_indices = @transform_2, window_bounds = array<i64: 1, 512>}, {pipeline_mode = #tpu.pipeline_mode<synchronous>, transform_indices = @transform_3, window_bounds = array<i64: 512, 512>}, {pipeline_mode = #tpu.pipeline_mode<synchronous>, transform_indices = @transform_4, window_bounds = array<i64: 1, 512>}, {pipeline_mode = #tpu.pipeline_mode<synchronous>, transform_indices = @transform_5, window_bounds = array<i64: 512, 128>}, {pipeline_mode = #tpu.pipeline_mode<synchronous>, transform_indices = @transform_6, window_bounds = array<i64: 1, 128>}, {transform_indices = @transform_7, window_bounds = array<i64: 8, 128>}]} {
    %c0 = arith.constant 0 : index
    %c0_0 = arith.constant 0 : index
    %0 = vector.load %arg1[%c0, %c0_0] : memref<8x896xf32, #tpu.memory_space<vmem>>, vector<8x896xf32>
    %1 = arith.truncf %0 : vector<8x896xf32> to vector<8x896xbf16>
    %c0_1 = arith.constant 0 : index
    %c0_2 = arith.constant 0 : index
    %2 = vector.load %arg2[%c0_1, %c0_2] : memref<896x512xbf16, #tpu.memory_space<vmem>>, vector<896x512xbf16>
    %cst = arith.constant dense<0.000000e+00> : vector<8x512xf32>
    %3 = tpu.matmul %1, %2, %cst {dimension_numbers = #tpu.dot_dimension_numbers<[1], [0], [0], [1], [0, 0, 1, 1], [], []>} : vector<8x896xbf16>, vector<896x512xbf16>, vector<8x512xf32> -> vector<8x512xf32>
    %c0_3 = arith.constant 0 : index
    %c0_4 = arith.constant 0 : index
    %4 = vector.load %arg3[%c0_3, %c0_4] : memref<1x512xf32, #tpu.memory_space<vmem>>, vector<1x512xf32>
    %5 = vector.broadcast %4 : vector<1x512xf32> to vector<8x512xf32>
    %6 = arith.addf %3, %5 : vector<8x512xf32>
    %cst_5 = arith.constant 0.000000e+00 : f32
    %7 = vector.broadcast %cst_5 : f32 to vector<8x512xf32>
    %8 = arith.maximumf %6, %7 : vector<8x512xf32>
    %9 = arith.truncf %8 : vector<8x512xf32> to vector<8x512xbf16>
    %c0_6 = arith.constant 0 : index
    %c0_7 = arith.constant 0 : index
    %10 = vector.load %arg4[%c0_6, %c0_7] : memref<512x512xbf16, #tpu.memory_space<vmem>>, vector<512x512xbf16>
    %cst_8 = arith.constant dense<0.000000e+00> : vector<8x512xf32>
    %11 = tpu.matmul %9, %10, %cst_8 {dimension_numbers = #tpu.dot_dimension_numbers<[1], [0], [0], [1], [0, 0, 1, 1], [], []>} : vector<8x512xbf16>, vector<512x512xbf16>, vector<8x512xf32> -> vector<8x512xf32>
    %c0_9 = arith.constant 0 : index
    %c0_10 = arith.constant 0 : index
    %12 = vector.load %arg5[%c0_9, %c0_10] : memref<1x512xf32, #tpu.memory_space<vmem>>, vector<1x512xf32>
    %13 = vector.broadcast %12 : vector<1x512xf32> to vector<8x512xf32>
    %14 = arith.addf %11, %13 : vector<8x512xf32>
    %cst_11 = arith.constant 0.000000e+00 : f32
    %15 = vector.broadcast %cst_11 : f32 to vector<8x512xf32>
    %16 = arith.maximumf %14, %15 : vector<8x512xf32>
    %17 = arith.truncf %16 : vector<8x512xf32> to vector<8x512xbf16>
    %c0_12 = arith.constant 0 : index
    %c0_13 = arith.constant 0 : index
    %18 = vector.load %arg6[%c0_12, %c0_13] : memref<512x128xbf16, #tpu.memory_space<vmem>>, vector<512x128xbf16>
    %cst_14 = arith.constant dense<0.000000e+00> : vector<8x128xf32>
    %19 = tpu.matmul %17, %18, %cst_14 {dimension_numbers = #tpu.dot_dimension_numbers<[1], [0], [0], [1], [0, 0, 1, 1], [], []>} : vector<8x512xbf16>, vector<512x128xbf16>, vector<8x128xf32> -> vector<8x128xf32>
    %c0_15 = arith.constant 0 : index
    %c0_16 = arith.constant 0 : index
    %20 = vector.load %arg7[%c0_15, %c0_16] : memref<1x128xf32, #tpu.memory_space<vmem>>, vector<1x128xf32>
    %21 = vector.broadcast %20 : vector<1x128xf32> to vector<8x128xf32>
    %22 = arith.addf %19, %21 : vector<8x128xf32>
    %c0_17 = arith.constant 0 : index
    %c0_18 = arith.constant 0 : index
    %23 = vector.load %arg8[%c0_17, %c0_18] : memref<8x128xf32, #tpu.memory_space<vmem>>, vector<8x128xf32>
    tpu.vector_store %arg8[%c0_17, %c0_18], %22 {strides = array<i32>} : memref<8x128xf32, #tpu.memory_space<vmem>>, vector<8x128xf32>,
    return
  }
  func.func @transform_0(%arg0: i32) -> (i32, i32) {
    %c0_i32 = arith.constant 0 : i32
    %c0_i32_0 = arith.constant 0 : i32
    return %arg0, %c0_i32 : i32, i32
  }
  func.func @transform_1(%arg0: i32) -> (i32, i32) {
    %c0_i32 = arith.constant 0 : i32
    %c0_i32_0 = arith.constant 0 : i32
    %c0_i32_1 = arith.constant 0 : i32
    return %c0_i32, %c0_i32_0 : i32, i32
  }
  func.func @transform_2(%arg0: i32) -> (i32, i32) {
    %c0_i32 = arith.constant 0 : i32
    %c0_i32_0 = arith.constant 0 : i32
    %c0_i32_1 = arith.constant 0 : i32
    return %c0_i32, %c0_i32_0 : i32, i32
  }
  func.func @transform_3(%arg0: i32) -> (i32, i32) {
    %c0_i32 = arith.constant 0 : i32
    %c0_i32_0 = arith.constant 0 : i32
    %c0_i32_1 = arith.constant 0 : i32
    return %c0_i32, %c0_i32_0 : i32, i32
  }
  func.func @transform_4(%arg0: i32) -> (i32, i32) {
    %c0_i32 = arith.constant 0 : i32
    %c0_i32_0 = arith.constant 0 : i32
    %c0_i32_1 = arith.constant 0 : i32
    return %c0_i32, %c0_i32_0 : i32, i32
  }
  func.func @transform_5(%arg0: i32) -> (i32, i32) {
    %c0_i32 = arith.constant 0 : i32
    %c0_i32_0 = arith.constant 0 : i32
    %c0_i32_1 = arith.constant 0 : i32
    return %c0_i32, %c0_i32_0 : i32, i32
  }
  func.func @transform_6(%arg0: i32) -> (i32, i32) {
    %c0_i32 = arith.constant 0 : i32
    %c0_i32_0 = arith.constant 0 : i32
    %c0_i32_1 = arith.constant 0 : i32
    return %c0_i32, %c0_i32_0 : i32, i32
  }
  func.func @transform_7(%arg0: i32) -> (i32, i32) {
    %c0_i32 = arith.constant 0 : i32
    %c0_i32_0 = arith.constant 0 : i32
    return %arg0, %c0_i32 : i32, i32
  }
}

</mosaic_0001>

<bundles_post_ra>
// kernel: neural_network_forward.1
= control target key start
LH: loop header
LB: loop body
LE: loop exit
PB: predicated region body
PF: predicated region fallthrough
CT: control target
= control target key end

     0   :  { %12 = vsyncpa [#allocation3], 0  ;;  %s5455_s0 = inlined_call_operand.vmem [shape: f32[8,896], index: 0, kind: input, shape index: {}]   ;;  %s5456_s1 = inlined_call_operand.hbm [shape: bf16[896,512], index: 1, kind: input, shape index: {}]   ;;  %s5457_s2 = inlined_call_operand.vmem [shape: f32[1,512], index: 2, kind: input, shape index: {}]   ;;  %s5458_s3 = inlined_call_operand.hbm [shape: bf16[512,512], index: 3, kind: input, shape index: {}]   ;;  %s5459_s4 = inlined_call_operand.vmem [shape: f32[1,512], index: 4, kind: input, shape index: {}]   ;;  %s5460_s5 = inlined_call_operand.vmem [shape: bf16[512,128], index: 5, kind: input, shape index: {}]   ;;  %s5461_s6 = inlined_call_operand.vmem [shape: f32[1,128], index: 6, kind: input, shape index: {}]   ;;  %s5462_s7 = inlined_call_operand.hbm [shape: f32[8,128], index: 7, kind: output, shape index: {}]  }
   0x1   :  { %13 = vsyncpa [#allocation6], 0 }
   0x2   :  { %14 = vsyncpa [#allocation4], 0  ;;  %s21_s26 = sshll.u32 %s5456_s1, 4  ;;  %s5129_s27 = smov [#allocation2]   ;;  %s22_s26 = int_to_ptr.hbm [resolvable:$true] %s21_s26 }
   0x3   :  { %s23_s28 = sshll.u32 %s5129_s27, 4  ;;  %s36_s8 = sshll.u32 %s5458_s3, 4  ;;  %s24_s28 = int_to_ptr.vmem [resolvable:$true] %s23_s28  ;;  %s37_s8 = int_to_ptr.hbm [resolvable:$true] %s36_s8 }
   0x4   :  { %s5130_s9 = smov 256   ;;  %s5131_s10 = smov 16  }
   0x5   :  { %29 = dma.hbm_to_vmem [thread:$0]  %s22_s26, 28672, %s24_s28, [#allocation3], %s5130_s9, %s5130_s9, %s5131_s10  }
   0x6   :  { %s5132_s11 = smov [#allocation5]  }
   0x7   :  { %s38_s12 = sshll.u32 %s5132_s11, 4  ;;  %s39_s12 = int_to_ptr.vmem [resolvable:$true] %s38_s12 }
   0x8   :  { %44 = dma.hbm_to_vmem [thread:$0]  %s37_s8, 16384, %s39_s12, [#allocation6], %s5130_s9, %s5130_s9, %s5131_s10  }
   0x9   :  { %5123 = dma.done.wait [#allocation3], 28672  }
   0xa   :  { %5124 = vsyncadd [#allocation3], 4294938624 }
   0xb   :  { %5125 = dma.done.wait [#allocation6], 16384  }
   0xc   :  { %5126 = vsyncadd [#allocation6], 4294950912  ;;  %v3238_v0 = vld [vmem:[#allocation2 + $0xe0] sm:$0xf]  ;;  %v4690_v1 = vld [vmem:[#allocation2 + $0xec] sm:$0xf0] }
   0xd   :  { %v3366_v2 = vld [vmem:[#allocation2 + $0x1e0] sm:$0xf]  ;;  %v3239_v3 = vor.u32 %v4690_v1, %v3238_v0  ;;  %v4722_v4 = vld [vmem:[#allocation2 + $0x1ec] sm:$0xf0]  ;;  %s5133_s3 = smov [#allocation7]   ;;  %s3113_s16 = sshll.u32 %s5462_s7, 4  ;;  %s3114_s16 = int_to_ptr.hbm [resolvable:$true] %s3113_s16 }
   0xe   :  { %v3494_v5 = vld [vmem:[#allocation2 + $0x2e0] sm:$0xf]  ;;  %v4754_v6 = vld [vmem:[#allocation2 + $0x2ec] sm:$0xf0]  ;;  %v3367_v7 = vor.u32 %v4722_v4, %v3366_v2  ;;  %s3111_s13 = sshll.u32 %s5133_s3, 4  ;;  %s3112_s13 = int_to_ptr.vmem [resolvable:$true] %s3111_s13 }
   0xf   :  { %v3495_v8 = vor.u32 %v4754_v6, %v3494_v5  ;;  %v3622_v9 = vld [vmem:[#allocation2 + $0x3e0] sm:$0xf]  ;;  %v4786_v10 = vld [vmem:[#allocation2 + $0x3ec] sm:$0xf0]  ;;  %1427 = vmatpush.bf16.msra.mxu0 %v3239_v3 }
  0x10   :  { %v3222_v11 = vld [vmem:[#allocation2 + $0xc0] sm:$0xf]  ;;  %v3623_v12 = vor.u32 %v4786_v10, %v3622_v9  ;;  %v4686_v13 = vld [vmem:[#allocation2 + $0xcc] sm:$0xf0]  ;;  %1440 = vmatpush.bf16.msra.mxu1 %v3367_v7 }
  0x11   :  { %v3350_v14 = vld [vmem:[#allocation2 + $0x1c0] sm:$0xf]  ;;  %v4718_v15 = vld [vmem:[#allocation2 + $0x1cc] sm:$0xf0]  ;;  %1453 = vmatpush.bf16.msra.mxu2 %v3495_v8  ;;  %v3223_v16 = vor.u32 %v4686_v13, %v3222_v11 }
  0x12   :  { %v3351_v17 = vor.u32 %v4718_v15, %v3350_v14  ;;  %v3478_v18 = vld [vmem:[#allocation2 + $0x2c0] sm:$0xf]  ;;  %v4750_v19 = vld [vmem:[#allocation2 + $0x2cc] sm:$0xf0]  ;;  %1466 = vmatpush.bf16.msra.mxu3 %v3623_v12 }
  0x13   :  { %v3606_v20 = vld [vmem:[#allocation2 + $0x3c0] sm:$0xf]  ;;  %v3479_v21 = vor.u32 %v4750_v19, %v3478_v18  ;;  %v4782_v22 = vld [vmem:[#allocation2 + $0x3cc] sm:$0xf0]  ;;  %1428 = vmatpush.bf16.msra.mxu0 %v3223_v16 }
  0x14   :  { %v3206_v23 = vld [vmem:[#allocation2 + $0xa0] sm:$0xf]  ;;  %v4682_v24 = vld [vmem:[#allocation2 + $0xac] sm:$0xf0]  ;;  %v3607_v25 = vor.u32 %v4782_v22, %v3606_v20  ;;  %1441 = vmatpush.bf16.msra.mxu1 %v3351_v17 }
  0x15   :  { %v3334_v26 = vld [vmem:[#allocation2 + $0x1a0] sm:$0xf]  ;;  %v4714_v27 = vld [vmem:[#allocation2 + $0x1ac] sm:$0xf0]  ;;  %v3207_v29 = vor.u32 %v4682_v24, %v3206_v23  ;;  %1454 = vmatpush.bf16.msra.mxu2 %v3479_v21 }
  0x16   :  { %v3462_v28 = vld [vmem:[#allocation2 + $0x2a0] sm:$0xf]  ;;  %v4746_v30 = vld [vmem:[#allocation2 + $0x2ac] sm:$0xf0]  ;;  %v3335_v33 = vor.u32 %v4714_v27, %v3334_v26  ;;  %1467 = vmatpush.bf16.msra.mxu3 %v3607_v25 }
  0x17   :  { %v3590_v31 = vld [vmem:[#allocation2 + $0x3a0] sm:$0xf]  ;;  %v4778_v32 = vld [vmem:[#allocation2 + $0x3ac] sm:$0xf0]  ;;  %v3463_v34 = vor.u32 %v4746_v30, %v3462_v28  ;;  %1429 = vmatpush.bf16.msra.mxu0 %v3207_v29 }
  0x18   :  { %v3190_v35 = vld [vmem:[#allocation2 + $0x80] sm:$0xf]  ;;  %v4678_v36 = vld [vmem:[#allocation2 + $0x8c] sm:$0xf0]  ;;  %v3591_v38 = vor.u32 %v4778_v32, %v3590_v31  ;;  %1442 = vmatpush.bf16.msra.mxu1 %v3335_v33 }
  0x19   :  { %v3318_v37 = vld [vmem:[#allocation2 + $0x180] sm:$0xf]  ;;  %v4710_v39 = vld [vmem:[#allocation2 + $0x18c] sm:$0xf0]  ;;  %v3191_v44 = vor.u32 %v4678_v36, %v3190_v35  ;;  %1455 = vmatpush.bf16.msra.mxu2 %v3463_v34 }
  0x1a   :  { %v3446_v40 = vld [vmem:[#allocation2 + $0x280] sm:$0xf]  ;;  %v4742_v41 = vld [vmem:[#allocation2 + $0x28c] sm:$0xf0]  ;;  %v3319_v45 = vor.u32 %v4710_v39, %v3318_v37  ;;  %1468 = vmatpush.bf16.msra.mxu3 %v3591_v38  ;;  %v4688_v37 = vld [vmem:[#allocation2 + $0xe4] sm:$0xf] }
  0x1b   :  { %v3574_v42 = vld [vmem:[#allocation2 + $0x380] sm:$0xf]  ;;  %v4774_v43 = vld [vmem:[#allocation2 + $0x38c] sm:$0xf0]  ;;  %v3447_v46 = vor.u32 %v4742_v41, %v3446_v40  ;;  %1430 = vmatpush.bf16.msra.mxu0 %v3191_v44  ;;  %v3240_v38 = vld [vmem:[#allocation2 + $0xf0] sm:$0xf0] }
  0x1c   :  { %v3174_v47 = vld [vmem:[#allocation2 + $0x60] sm:$0xf]  ;;  %v4674_v48 = vld [vmem:[#allocation2 + $0x6c] sm:$0xf0]  ;;  %v3575_v50 = vor.u32 %v4774_v43, %v3574_v42  ;;  %1443 = vmatpush.bf16.msra.mxu1 %v3319_v45 }
  0x1d   :  { %v3302_v49 = vld [vmem:[#allocation2 + $0x160] sm:$0xf]  ;;  %v4706_v51 = vld [vmem:[#allocation2 + $0x16c] sm:$0xf0]  ;;  %v3175_v56 = vor.u32 %v4674_v48, %v3174_v47  ;;  %1456 = vmatpush.bf16.msra.mxu2 %v3447_v46  ;;  %v3243_v46 = vor.u32 %v4688_v37, %v3240_v38 }
  0x1e   :  { %v3430_v52 = vld [vmem:[#allocation2 + $0x260] sm:$0xf]  ;;  %v4738_v53 = vld [vmem:[#allocation2 + $0x26c] sm:$0xf0]  ;;  %v3303_v57 = vor.u32 %v4706_v51, %v3302_v49  ;;  %1469 = vmatpush.bf16.msra.mxu3 %v3575_v50  ;;  %v4684_v50 = vld [vmem:[#allocation2 + $0xc4] sm:$0xf] }
  0x1f   :  { %v3558_v54 = vld [vmem:[#allocation2 + $0x360] sm:$0xf]  ;;  %v4770_v55 = vld [vmem:[#allocation2 + $0x36c] sm:$0xf0]  ;;  %v3431_v58 = vor.u32 %v4738_v53, %v3430_v52  ;;  %1431 = vmatpush.bf16.msra.mxu0 %v3175_v56  ;;  %v3224_v51 = vld [vmem:[#allocation2 + $0xd0] sm:$0xf0] }
  0x20   :  { %v3158_v59 = vld [vmem:[#allocation2 + $0x40] sm:$0xf]  ;;  %v4670_v60 = vld [vmem:[#allocation2 + $0x4c] sm:$0xf0]  ;;  %v3559_v62 = vor.u32 %v4770_v55, %v3558_v54  ;;  %1444 = vmatpush.bf16.msra.mxu1 %v3303_v57 }
  0x21   :  { %v3286_v61 = vld [vmem:[#allocation2 + $0x140] sm:$0xf]  ;;  %v4702_v63 = vld [vmem:[#allocation2 + $0x14c] sm:$0xf0]  ;;  %v3159_v4 = vor.u32 %v4670_v60, %v3158_v59  ;;  %1457 = vmatpush.bf16.msra.mxu2 %v3431_v58  ;;  %v3227_v59 = vor.u32 %v4684_v50, %v3224_v51 }
  0x22   :  { %v3414_v0 = vld [vmem:[#allocation2 + $0x240] sm:$0xf]  ;;  %v4734_v1 = vld [vmem:[#allocation2 + $0x24c] sm:$0xf0]  ;;  %v3287_v5 = vor.u32 %v4702_v63, %v3286_v61  ;;  %1470 = vmatpush.bf16.msra.mxu3 %v3559_v62  ;;  %v4680_v62 = vld [vmem:[#allocation2 + $0xa4] sm:$0xf] }
  0x23   :  { %v3542_v2 = vld [vmem:[#allocation2 + $0x340] sm:$0xf]  ;;  %v4766_v3 = vld [vmem:[#allocation2 + $0x34c] sm:$0xf0]  ;;  %v3415_v6 = vor.u32 %v4734_v1, %v3414_v0  ;;  %1432 = vmatpush.bf16.msra.mxu0 %v3159_v4  ;;  %v3208_v63 = vld [vmem:[#allocation2 + $0xb0] sm:$0xf0] }
  0x24   :  { %v3142_v7 = vld [vmem:[#allocation2 + $0x20] sm:$0xf]  ;;  %v4666_v8 = vld [vmem:[#allocation2 + $0x2c] sm:$0xf0]  ;;  %v3543_v10 = vor.u32 %v4766_v3, %v3542_v2  ;;  %1445 = vmatpush.bf16.msra.mxu1 %v3287_v5 }
  0x25   :  { %v3270_v9 = vld [vmem:[#allocation2 + $0x120] sm:$0xf]  ;;  %v4698_v11 = vld [vmem:[#allocation2 + $0x12c] sm:$0xf0]  ;;  %v3143_v16 = vor.u32 %v4666_v8, %v3142_v7  ;;  %1458 = vmatpush.bf16.msra.mxu2 %v3415_v6 }
  0x26   :  { %v3398_v12 = vld [vmem:[#allocation2 + $0x220] sm:$0xf]  ;;  %v4730_v13 = vld [vmem:[#allocation2 + $0x22c] sm:$0xf0]  ;;  %v3271_v19 = vor.u32 %v4698_v11, %v3270_v9  ;;  %1471 = vmatpush.bf16.msra.mxu3 %v3543_v10  ;;  %v62_v10 = vld [vmem:[%s5455_s0 + $0x18] sm:$0xff]  ;;  %v3211_v11 = vor.u32 %v4680_v62, %v3208_v63 }
  0x27   :  { %v3526_v14 = vld [vmem:[#allocation2 + $0x320] sm:$0xf]  ;;  %v4762_v15 = vld [vmem:[#allocation2 + $0x32c] sm:$0xf0]  ;;  %v3399_v20 = vor.u32 %v4730_v13, %v3398_v12  ;;  %1433 = vmatpush.bf16.msra.mxu0 %v3143_v16  ;;  %v4676_v16 = vld [vmem:[#allocation2 + $0x84] sm:$0xf] }
  0x28   :  { %v3126_v17 = vld [vmem:[#allocation2] sm:$0xf]  ;;  %v4662_v18 = vld [vmem:[#allocation2 + $0xc] sm:$0xf0]  ;;  %v3527_v24 = vor.u32 %v4762_v15, %v3526_v14  ;;  %1446 = vmatpush.bf16.msra.mxu1 %v3271_v19  ;;  %v5193_v15 = vpack.c.bf16 %v62_v10, %v62_v10  ;;  %v60_v19 = vld [vmem:[%s5455_s0 + $0x8] sm:$0xff] }
  0x29   :  { %v3254_v21 = vld [vmem:[#allocation2 + $0x100] sm:$0xf]  ;;  %v4694_v22 = vld [vmem:[#allocation2 + $0x10c] sm:$0xf0]  ;;  %v3127_v31 = vor.u32 %v4662_v18, %v3126_v17  ;;  %1459 = vmatpush.bf16.msra.mxu2 %v3399_v20  ;;  %v3192_v17 = vld [vmem:[#allocation2 + $0x90] sm:$0xf0] }
  0x2a   :  { %v3382_v23 = vld [vmem:[#allocation2 + $0x200] sm:$0xf]  ;;  %v4726_v25 = vld [vmem:[#allocation2 + $0x20c] sm:$0xf0]  ;;  %v3255_v35 = vor.u32 %v4694_v22, %v3254_v21  ;;  %1472 = vmatpush.bf16.msra.mxu3 %v3527_v24  ;;  %v3496_v10 = vld [vmem:[#allocation2 + $0x2f0] sm:$0xf0] }
  0x2b   :  { %v3510_v26 = vld [vmem:[#allocation2 + $0x300] sm:$0xf]  ;;  %v4758_v27 = vld [vmem:[#allocation2 + $0x30c] sm:$0xf0]  ;;  %v3383_v36 = vor.u32 %v4726_v25, %v3382_v23  ;;  %1434 = vmatpush.bf16.msra.mxu0 %v3127_v31  ;;  %v5201_v25 = vpack.c.bf16 %v60_v19, %v60_v19  ;;  %v3176_v31 = vld [vmem:[#allocation2 + $0x70] sm:$0xf0] }
  0x2c   :  { %v3750_v28 = vld [vmem:[#allocation2 + $0x4e0] sm:$0xf]  ;;  %v4818_v29 = vld [vmem:[#allocation2 + $0x4ec] sm:$0xf0]  ;;  %v3511_v39 = vor.u32 %v4758_v27, %v3510_v26  ;;  %1447 = vmatpush.bf16.msra.mxu1 %v3255_v35  ;;  %v3195_v26 = vor.u32 %v4676_v16, %v3192_v17  ;;  %v4816_v16 = vld [vmem:[#allocation2 + $0x4e4] sm:$0xf] }
  0x2d   :  { %v3878_v30 = vld [vmem:[#allocation2 + $0x5e0] sm:$0xf]  ;;  %v4850_v32 = vld [vmem:[#allocation2 + $0x5ec] sm:$0xf0]  ;;  %v3751_v40 = vor.u32 %v4818_v29, %v3750_v28  ;;  %1460 = vmatpush.bf16.msra.mxu2 %v3383_v36  ;;  %v3752_v17 = vld [vmem:[#allocation2 + $0x4f0] sm:$0xf0] }
  0x2e   :  { %v4006_v33 = vld [vmem:[#allocation2 + $0x6e0] sm:$0xf]  ;;  %v4882_v34 = vld [vmem:[#allocation2 + $0x6ec] sm:$0xf0]  ;;  %v3879_v41 = vor.u32 %v4850_v32, %v3878_v30  ;;  %1473 = vmatpush.bf16.msra.mxu3 %v3511_v39  ;;  %v4672_v30 = vld [vmem:[#allocation2 + $0x64] sm:$0xf] }
  0x2f   :  { %v4007_v42 = vor.u32 %v4882_v34, %v4006_v33  ;;  %v3734_v43 = vld [vmem:[#allocation2 + $0x4c0] sm:$0xf]  ;;  %v4814_v44 = vld [vmem:[#allocation2 + $0x4cc] sm:$0xf0]  ;;  %1479 = vmatpush.bf16.msrb.mxu0 %v3751_v40  ;;  %1448 = vmatmul.bf16.vlgmr.msra.gmra.mxu1 %v5201_v25  ;;  %v3179_v38 = vor.u32 %v4672_v30, %v3176_v31  ;;  %v3480_v30 = vld [vmem:[#allocation2 + $0x2d0] sm:$0xf0] }
  0x30   :  { %v3862_v45 = vld [vmem:[#allocation2 + $0x5c0] sm:$0xf]  ;;  %v4846_v47 = vld [vmem:[#allocation2 + $0x5cc] sm:$0xf0]  ;;  %v3735_v52 = vor.u32 %v4814_v44, %v3734_v43  ;;  %1492 = vmatpush.bf16.msrb.mxu1 %v3879_v41  ;;  %v3160_v43 = vld [vmem:[#allocation2 + $0x50] sm:$0xf0] }
  0x31   :  { %v3990_v48 = vld [vmem:[#allocation2 + $0x6c0] sm:$0xf]  ;;  %v4878_v49 = vld [vmem:[#allocation2 + $0x6cc] sm:$0xf0]  ;;  %1505 = vmatpush.bf16.msrb.mxu2 %v4007_v42  ;;  %v3863_v54 = vor.u32 %v4846_v47, %v3862_v45  ;;  %1474 = vmatmul.bf16.vlgmr.msra.gmra.mxu3 %v5193_v15  ;;  %v4668_v42 = vld [vmem:[#allocation2 + $0x44] sm:$0xf] }
  0x32   :  { %v3718_v53 = vld [vmem:[#allocation2 + $0x4a0] sm:$0xf]  ;;  %v3991_v55 = vor.u32 %v4878_v49, %v3990_v48  ;;  %v4810_v56 = vld [vmem:[#allocation2 + $0x4ac] sm:$0xf0]  ;;  %1518 = vmatpush.bf16.msrb.mxu3 %v3243_v46  ;;  %v3163_v50 = vor.u32 %v4668_v42, %v3160_v43  ;;  %v4780_v31 = vld [vmem:[#allocation2 + $0x3c4] sm:$0xf] }
  0x33   :  { %v3846_v57 = vld [vmem:[#allocation2 + $0x5a0] sm:$0xf]  ;;  %v4842_v58 = vld [vmem:[#allocation2 + $0x5ac] sm:$0xf0]  ;;  %1480 = vmatpush.bf16.msrb.mxu0 %v3735_v52  ;;  %v3719_v0 = vor.u32 %v4810_v56, %v3718_v53  ;;  %v3336_v42 = vld [vmem:[#allocation2 + $0x1b0] sm:$0xf0] }
  0x34   :  { %v3974_v60 = vld [vmem:[#allocation2 + $0x6a0] sm:$0xf]  ;;  %v4874_v61 = vld [vmem:[#allocation2 + $0x6ac] sm:$0xf0]  ;;  %v3847_v1 = vor.u32 %v4842_v58, %v3846_v57  ;;  %1493 = vmatpush.bf16.msrb.mxu1 %v3863_v54  ;;  %v4664_v54 = vld [vmem:[#allocation2 + $0x24] sm:$0xf] }
  0x35   :  { %v3702_v2 = vld [vmem:[#allocation2 + $0x480] sm:$0xf]  ;;  %v61_v3 = vld [vmem:[%s5455_s0 + $0x10] sm:$0xff]  ;;  %1506 = vmatpush.bf16.msrb.mxu2 %v3991_v55  ;;  %v3975_v5 = vor.u32 %v4874_v61, %v3974_v60  ;;  %v4744_v43 = vld [vmem:[#allocation2 + $0x2a4] sm:$0xf] }
  0x36   :  { %v59_v4 = vld [vmem:[%s5455_s0] sm:$0xff]  ;;  %v4806_v6 = vld [vmem:[#allocation2 + $0x48c] sm:$0xf0]  ;;  %v5186_v8 = vpack.c.bf16 %v61_v3, %v61_v3  ;;  %1519 = vmatpush.bf16.msrb.mxu3 %v3227_v59  ;;  %v3144_v55 = vld [vmem:[#allocation2 + $0x30] sm:$0xf0] }
  0x37   :  { %v3830_v7 = vld [vmem:[#allocation2 + $0x580] sm:$0xf]  ;;  %v5188_v9 = vpack.c.bf16 %v59_v4, %v59_v4  ;;  %v4838_v12 = vld [vmem:[#allocation2 + $0x58c] sm:$0xf0]  ;;  %1481 = vmatpush.bf16.msrb.mxu0 %v3719_v0  ;;  %v3703_v18 = vor.u32 %v4806_v6, %v3702_v2  ;;  %v3147_v0 = vor.u32 %v4664_v54, %v3144_v55  ;;  %v4660_v2 = vld [vmem:[#allocation2 + $0x4] sm:$0xf] }
  0x38   :  { %v3958_v13 = vld [vmem:[#allocation2 + $0x680] sm:$0xf]  ;;  %v4870_v14 = vld [vmem:[#allocation2 + $0x68c] sm:$0xf0]  ;;  %1461 = vmatmul.bf16.vlgmr.msra.gmra.mxu2 %v5186_v8  ;;  %1494 = vmatpush.bf16.msrb.mxu1 %v3847_v1  ;;  %v3831_v20 = vor.u32 %v4838_v12, %v3830_v7  ;;  %v3128_v3 = vld [vmem:[#allocation2 + $0x10] sm:$0xf0] }
  0x39   :  { %1435 = vmatmul.bf16.vlgmr.msra.gmra.mxu0 %v5188_v9  ;;  %1507 = vmatpush.bf16.msrb.mxu2 %v3975_v5  ;;  %v3959_v21 = vor.u32 %v4870_v14, %v3958_v13  ;;  %v3686_v22 = vld [vmem:[#allocation2 + $0x460] sm:$0xf]  ;;  %v4802_v23 = vld [vmem:[#allocation2 + $0x46c] sm:$0xf0]  ;;  %v4720_v4 = vld [vmem:[#allocation2 + $0x1e4] sm:$0xf]  ;;  %v3131_v19 = vor.u32 %v4660_v2, %v3128_v3 }
  0x3a   :  { %v3814_v24 = vld [vmem:[#allocation2 + $0x560] sm:$0xf]  ;;  %1520 = vmatpush.bf16.msrb.mxu3 %v3211_v11  ;;  %v4834_v27 = vld [vmem:[#allocation2 + $0x56c] sm:$0xf0]  ;;  %v3687_v32 = vor.u32 %v4802_v23, %v3686_v22  ;;  %v3368_v5 = vld [vmem:[#allocation2 + $0x1f0] sm:$0xf0] }
  0x3b   :  { %v3942_v28 = vld [vmem:[#allocation2 + $0x660] sm:$0xf]  ;;  %v4866_v29 = vld [vmem:[#allocation2 + $0x66c] sm:$0xf0]  ;;  %1482 = vmatpush.bf16.msrb.mxu0 %v3703_v18  ;;  %v3815_v33 = vor.u32 %v4834_v27, %v3814_v24  ;;  %v4752_v6 = vld [vmem:[#allocation2 + $0x2e4] sm:$0xf] }
  0x3c   :  { %1495 = vmatpush.bf16.msrb.mxu1 %v3831_v20  ;;  %v3943_v34 = vor.u32 %v4866_v29, %v3942_v28  ;;  %v3670_v35 = vld [vmem:[#allocation2 + $0x440] sm:$0xf]  ;;  %v4798_v36 = vld [vmem:[#allocation2 + $0x44c] sm:$0xf0]  ;;  %v4784_v11 = vld [vmem:[#allocation2 + $0x3e4] sm:$0xf]  ;;  %v3371_v20 = vor.u32 %v4720_v4, %v3368_v5  ;;  %v3499_v23 = vor.u32 %v4752_v6, %v3496_v10  ;;  %v3755_v29 = vor.u32 %v4816_v16, %v3752_v17 }
  0x3d   :  { %1508 = vmatpush.bf16.msrb.mxu2 %v3959_v21  ;;  %v3798_v37 = vld [vmem:[#allocation2 + $0x540] sm:$0xf]  ;;  %v4830_v39 = vld [vmem:[#allocation2 + $0x54c] sm:$0xf0]  ;;  %v3671_v44 = vor.u32 %v4798_v36, %v3670_v35  ;;  %v3624_v12 = vld [vmem:[#allocation2 + $0x3f0] sm:$0xf0] }
  0x3e   :  { %1521 = vmatpush.bf16.msrb.mxu3 %v3195_v26  ;;  %v3926_v40 = vld [vmem:[#allocation2 + $0x640] sm:$0xf]  ;;  %v4862_v41 = vld [vmem:[#allocation2 + $0x64c] sm:$0xf0]  ;;  %v3799_v45 = vor.u32 %v4830_v39, %v3798_v37  ;;  %v64_v22 = vld [vmem:[%s5455_s0 + $0x28] sm:$0xff]  ;;  %v3627_v24 = vor.u32 %v4784_v11, %v3624_v12 }
  0x3f   :  { %1483 = vmatpush.bf16.msrb.mxu0 %v3687_v32  ;;  %v3927_v46 = vor.u32 %v4862_v41, %v3926_v40  ;;  %v3654_v47 = vld [vmem:[#allocation2 + $0x420] sm:$0xf]  ;;  %v4794_v48 = vld [vmem:[#allocation2 + $0x42c] sm:$0xf0]  ;;  %v4716_v26 = vld [vmem:[#allocation2 + $0x1c4] sm:$0xf]  ;;  %v5217_v37 = vpack.c.bf16 %v64_v22, %v64_v22 }
  0x40   :  { %1496 = vmatpush.bf16.msrb.mxu1 %v3815_v33  ;;  %v3782_v49 = vld [vmem:[#allocation2 + $0x520] sm:$0xf]  ;;  %v4826_v51 = vld [vmem:[#allocation2 + $0x52c] sm:$0xf0]  ;;  %v3655_v56 = vor.u32 %v4794_v48, %v3654_v47  ;;  %v3352_v27 = vld [vmem:[#allocation2 + $0x1d0] sm:$0xf0] }
  0x41   :  { %1509 = vmatpush.bf16.msrb.mxu2 %v3943_v34  ;;  %v3910_v52 = vld [vmem:[#allocation2 + $0x620] sm:$0xf]  ;;  %v4858_v53 = vld [vmem:[#allocation2 + $0x62c] sm:$0xf0]  ;;  %v3783_v59 = vor.u32 %v4826_v51, %v3782_v49  ;;  %v4748_v28 = vld [vmem:[#allocation2 + $0x2c4] sm:$0xf] }
  0x42   :  { %1522 = vmatpush.bf16.msrb.mxu3 %v3179_v38  ;;  %v3638_v57 = vld [vmem:[#allocation2 + $0x400] sm:$0xf]  ;;  %v4790_v58 = vld [vmem:[#allocation2 + $0x40c] sm:$0xf0]  ;;  %v3911_v60 = vor.u32 %v4858_v53, %v3910_v52  ;;  %v3608_v32 = vld [vmem:[#allocation2 + $0x3d0] sm:$0xf0]  ;;  %v3355_v38 = vor.u32 %v4716_v26, %v3352_v27  ;;  %v3483_v39 = vor.u32 %v4748_v28, %v3480_v30 }
  0x43   :  { %1484 = vmatpush.bf16.msrb.mxu0 %v3671_v44  ;;  %v3766_v61 = vld [vmem:[#allocation2 + $0x500] sm:$0xf]  ;;  %v4822_v62 = vld [vmem:[#allocation2 + $0x50c] sm:$0xf0]  ;;  %v3639_v7 = vor.u32 %v4790_v58, %v3638_v57  ;;  %v4812_v34 = vld [vmem:[#allocation2 + $0x4c4] sm:$0xf]  ;;  %v3611_v40 = vor.u32 %v4780_v31, %v3608_v32 }
  0x44   :  { %1497 = vmatpush.bf16.msrb.mxu1 %v3799_v45  ;;  %v3894_v63 = vld [vmem:[#allocation2 + $0x600] sm:$0xf]  ;;  %v4854_v1 = vld [vmem:[#allocation2 + $0x60c] sm:$0xf0]  ;;  %v3767_v13 = vor.u32 %v4822_v62, %v3766_v61  ;;  %v3736_v35 = vld [vmem:[#allocation2 + $0x4d0] sm:$0xf0] }
  0x45   :  { %1510 = vmatpush.bf16.msrb.mxu2 %v3927_v46  ;;  %v3895_v14 = vor.u32 %v4854_v1, %v3894_v63  ;;  %v65_v18 = vld [vmem:[%s5455_s0 + $0x30] sm:$0xff]  ;;  %v63_v21 = vld [vmem:[%s5455_s0 + $0x20] sm:$0xff]  ;;  %v3739_v44 = vor.u32 %v4812_v34, %v3736_v35 }
  0x46   :  { %1523 = vmatpush.bf16.msrb.mxu3 %v3163_v50  ;;  %v5213_v33 = vpack.c.bf16 %v65_v18, %v65_v18  ;;  %v5215_v36 = vpack.c.bf16 %v63_v21, %v63_v21  ;;  %v4712_v41 = vld [vmem:[#allocation2 + $0x1a4] sm:$0xf]  ;;  %v3464_v45 = vld [vmem:[#allocation2 + $0x2b0] sm:$0xf0] }
  0x47   :  { %1485 = vmatpush.bf16.msrb.mxu0 %v3655_v56  ;;  %v4776_v46 = vld [vmem:[#allocation2 + $0x3a4] sm:$0xf]  ;;  %v3592_v47 = vld [vmem:[#allocation2 + $0x3b0] sm:$0xf0]  ;;  %v3339_v50 = vor.u32 %v4712_v41, %v3336_v42  ;;  %v3467_v51 = vor.u32 %v4744_v43, %v3464_v45 }
  0x48   :  { %1498 = vmatpush.bf16.msrb.mxu1 %v3783_v59  ;;  %v4808_v48 = vld [vmem:[#allocation2 + $0x4a4] sm:$0xf]  ;;  %v3720_v49 = vld [vmem:[#allocation2 + $0x4b0] sm:$0xf0]  ;;  %v3595_v52 = vor.u32 %v4776_v46, %v3592_v47 }
  0x49   :  { %1511 = vmatpush.bf16.msrb.mxu2 %v3911_v60  ;;  %v4708_v53 = vld [vmem:[#allocation2 + $0x184] sm:$0xf]  ;;  %v3320_v54 = vld [vmem:[#allocation2 + $0x190] sm:$0xf0]  ;;  %v3723_v56 = vor.u32 %v4808_v48, %v3720_v49 }
  0x4a   :  { %1524 = vmatpush.bf16.msrb.mxu3 %v3147_v0  ;;  %v4740_v55 = vld [vmem:[#allocation2 + $0x284] sm:$0xf]  ;;  %v3448_v57 = vld [vmem:[#allocation2 + $0x290] sm:$0xf0]  ;;  %v3323_v62 = vor.u32 %v4708_v53, %v3320_v54 }
  0x4b   :  { %1486 = vmatpush.bf16.msrb.mxu0 %v3639_v7  ;;  %v4772_v58 = vld [vmem:[#allocation2 + $0x384] sm:$0xf]  ;;  %v3576_v59 = vld [vmem:[#allocation2 + $0x390] sm:$0xf0]  ;;  %v3451_v63 = vor.u32 %v4740_v55, %v3448_v57 }
  0x4c   :  { %1499 = vmatpush.bf16.msrb.mxu1 %v3767_v13  ;;  %v4804_v60 = vld [vmem:[#allocation2 + $0x484] sm:$0xf]  ;;  %v3704_v61 = vld [vmem:[#allocation2 + $0x490] sm:$0xf0]  ;;  %v3579_v0 = vor.u32 %v4772_v58, %v3576_v59  ;;  %v3246_v58 = vld [vmem:[#allocation2 + $0xe8] sm:$0xf] }
  0x4d   :  { %1512 = vmatpush.bf16.msrb.mxu2 %v3895_v14  ;;  %v4704_v1 = vld [vmem:[#allocation2 + $0x164] sm:$0xf]  ;;  %v3304_v2 = vld [vmem:[#allocation2 + $0x170] sm:$0xf0]  ;;  %v3707_v4 = vor.u32 %v4804_v60, %v3704_v61  ;;  %v4691_v59 = vld [vmem:[#allocation2 + $0xf4] sm:$0xf0] }
  0x4e   :  { %1525 = vmatpush.bf16.msrb.mxu3 %v3131_v19  ;;  %1487 = vmatmul.bf16.vlgmr.msrb.gmra.mxu0 %v5215_v36  ;;  %v4736_v3 = vld [vmem:[#allocation2 + $0x264] sm:$0xf]  ;;  %v3432_v5 = vld [vmem:[#allocation2 + $0x270] sm:$0xf0]  ;;  %v3307_v12 = vor.u32 %v4704_v1, %v3304_v2 }
  0x4f   :  { %1531 = vmatpush.bf16.msra.mxu0 %v3371_v20  ;;  %1500 = vmatmul.bf16.vlgmr.msrb.gmra.mxu1 %v5217_v37  ;;  %v4768_v6 = vld [vmem:[#allocation2 + $0x364] sm:$0xf]  ;;  %v3560_v7 = vld [vmem:[#allocation2 + $0x370] sm:$0xf0]  ;;  %v3435_v13 = vor.u32 %v4736_v3, %v3432_v5  ;;  %v3247_v3 = vor.u32 %v4691_v59, %v3246_v58 }
  0x50   :  { %1544 = vmatpush.bf16.msra.mxu1 %v3499_v23  ;;  %1513 = vmatmul.bf16.vlgmr.msrb.gmra.mxu2 %v5213_v33  ;;  %v4800_v10 = vld [vmem:[#allocation2 + $0x464] sm:$0xf]  ;;  %v3688_v11 = vld [vmem:[#allocation2 + $0x470] sm:$0xf0]  ;;  %v3563_v14 = vor.u32 %v4768_v6, %v3560_v7 }
  0x51   :  { %1557 = vmatpush.bf16.msra.mxu2 %v3627_v24  ;;  %1526 = vmatmul.bf16.vlgmr.msrb.gmra.mxu3 %v5188_v9  ;;  %v4700_v16 = vld [vmem:[#allocation2 + $0x144] sm:$0xf]  ;;  %v3288_v17 = vld [vmem:[#allocation2 + $0x150] sm:$0xf0]  ;;  %v3691_v19 = vor.u32 %v4800_v10, %v3688_v11  ;;  %v3230_v11 = vld [vmem:[#allocation2 + $0xc8] sm:$0xf] }
  0x52   :  { %1570 = vmatpush.bf16.msra.mxu3 %v3755_v29  ;;  %v4732_v18 = vld [vmem:[#allocation2 + $0x244] sm:$0xf]  ;;  %v3416_v20 = vld [vmem:[#allocation2 + $0x250] sm:$0xf0]  ;;  %v3291_v26 = vor.u32 %v4700_v16, %v3288_v17 }
  0x53   :  { %1532 = vmatpush.bf16.msra.mxu0 %v3355_v38  ;;  %v4764_v21 = vld [vmem:[#allocation2 + $0x344] sm:$0xf]  ;;  %v3544_v22 = vld [vmem:[#allocation2 + $0x350] sm:$0xf0]  ;;  %v3419_v27 = vor.u32 %v4732_v18, %v3416_v20 }
  0x54   :  { %1545 = vmatpush.bf16.msra.mxu1 %v3483_v39  ;;  %v4796_v23 = vld [vmem:[#allocation2 + $0x444] sm:$0xf]  ;;  %v3672_v24 = vld [vmem:[#allocation2 + $0x450] sm:$0xf0]  ;;  %v3547_v28 = vor.u32 %v4764_v21, %v3544_v22 }
  0x55   :  { %1558 = vmatpush.bf16.msra.mxu2 %v3611_v40  ;;  %v4696_v29 = vld [vmem:[#allocation2 + $0x124] sm:$0xf]  ;;  %v3272_v30 = vld [vmem:[#allocation2 + $0x130] sm:$0xf0]  ;;  %v3675_v32 = vor.u32 %v4796_v23, %v3672_v24  ;;  %v3214_v24 = vld [vmem:[#allocation2 + $0xa8] sm:$0xf] }
  0x56   :  { %1571 = vmatpush.bf16.msra.mxu3 %v3739_v44  ;;  %v4728_v31 = vld [vmem:[#allocation2 + $0x224] sm:$0xf]  ;;  %v3400_v34 = vld [vmem:[#allocation2 + $0x230] sm:$0xf0]  ;;  %v3275_v41 = vor.u32 %v4696_v29, %v3272_v30 }
  0x57   :  { %1533 = vmatpush.bf16.msra.mxu0 %v3339_v50  ;;  %v4760_v35 = vld [vmem:[#allocation2 + $0x324] sm:$0xf]  ;;  %v3528_v38 = vld [vmem:[#allocation2 + $0x330] sm:$0xf0]  ;;  %v3403_v44 = vor.u32 %v4728_v31, %v3400_v34 }
  0x58   :  { %1546 = vmatpush.bf16.msra.mxu1 %v3467_v51  ;;  %v4792_v39 = vld [vmem:[#allocation2 + $0x424] sm:$0xf]  ;;  %v3656_v40 = vld [vmem:[#allocation2 + $0x430] sm:$0xf0]  ;;  %v3531_v45 = vor.u32 %v4760_v35, %v3528_v38 }
  0x59   :  { %1559 = vmatpush.bf16.msra.mxu2 %v3595_v52  ;;  %v4692_v42 = vld [vmem:[#allocation2 + $0x104] sm:$0xf]  ;;  %v3256_v43 = vld [vmem:[#allocation2 + $0x110] sm:$0xf0]  ;;  %v3659_v49 = vor.u32 %v4792_v39, %v3656_v40  ;;  %v3198_v40 = vld [vmem:[#allocation2 + $0x88] sm:$0xf] }
  0x5a   :  { %1572 = vmatpush.bf16.msra.mxu3 %v3723_v56  ;;  %v4724_v46 = vld [vmem:[#allocation2 + $0x204] sm:$0xf]  ;;  %v3384_v47 = vld [vmem:[#allocation2 + $0x210] sm:$0xf0]  ;;  %v3259_v56 = vor.u32 %v4692_v42, %v3256_v43  ;;  %v3326_v42 = vld [vmem:[#allocation2 + $0x188] sm:$0xf] }
  0x5b   :  { %1534 = vmatpush.bf16.msra.mxu0 %v3323_v62  ;;  %v4756_v48 = vld [vmem:[#allocation2 + $0x304] sm:$0xf]  ;;  %v3512_v50 = vld [vmem:[#allocation2 + $0x310] sm:$0xf0]  ;;  %v3387_v60 = vor.u32 %v4724_v46, %v3384_v47  ;;  %v3374_v62 = vld [vmem:[#allocation2 + $0x1e8] sm:$0xf] }
  0x5c   :  { %1547 = vmatpush.bf16.msra.mxu1 %v3451_v63  ;;  %v4788_v51 = vld [vmem:[#allocation2 + $0x404] sm:$0xf]  ;;  %v3640_v52 = vld [vmem:[#allocation2 + $0x410] sm:$0xf0]  ;;  %v3515_v61 = vor.u32 %v4756_v48, %v3512_v50  ;;  %v4723_v63 = vld [vmem:[#allocation2 + $0x1f4] sm:$0xf0] }
  0x5d   :  { %1560 = vmatpush.bf16.msra.mxu2 %v3579_v0  ;;  %v4848_v53 = vld [vmem:[#allocation2 + $0x5e4] sm:$0xf]  ;;  %v3880_v54 = vld [vmem:[#allocation2 + $0x5f0] sm:$0xf0]  ;;  %v3643_v0 = vor.u32 %v4788_v51, %v3640_v52  ;;  %v3375_v7 = vor.u32 %v4723_v63, %v3374_v62  ;;  %v4711_v43 = vld [vmem:[#allocation2 + $0x194] sm:$0xf0] }
  0x5e   :  { %1573 = vmatpush.bf16.msra.mxu3 %v3707_v4  ;;  %v4880_v55 = vld [vmem:[#allocation2 + $0x6e4] sm:$0xf]  ;;  %v4008_v57 = vld [vmem:[#allocation2 + $0x6f0] sm:$0xf0]  ;;  %v3883_v1 = vor.u32 %v4848_v53, %v3880_v54  ;;  %v3327_v50 = vor.u32 %v4711_v43, %v3326_v42  ;;  %v3182_v52 = vld [vmem:[#allocation2 + $0x68] sm:$0xf] }
  0x5f   :  { %1535 = vmatpush.bf16.msra.mxu0 %v3307_v12  ;;  %v4011_v2 = vor.u32 %v4880_v55, %v4008_v57  ;;  %v4844_v4 = vld [vmem:[#allocation2 + $0x5c4] sm:$0xf]  ;;  %v3864_v5 = vld [vmem:[#allocation2 + $0x5d0] sm:$0xf0]  ;;  %v4687_v12 = vld [vmem:[#allocation2 + $0xd4] sm:$0xf0] }
  0x60   :  { %1548 = vmatpush.bf16.msra.mxu1 %v3435_v13  ;;  %v4876_v6 = vld [vmem:[#allocation2 + $0x6c4] sm:$0xf]  ;;  %v3992_v10 = vld [vmem:[#allocation2 + $0x6d0] sm:$0xf0]  ;;  %v3358_v13 = vld [vmem:[#allocation2 + $0x1c8] sm:$0xf]  ;;  %v3867_v16 = vor.u32 %v4844_v4, %v3864_v5  ;;  %v3231_v18 = vor.u32 %v4687_v12, %v3230_v11 }
  0x61   :  { %1561 = vmatpush.bf16.msra.mxu2 %v3563_v14  ;;  %v4719_v14 = vld [vmem:[#allocation2 + $0x1d4] sm:$0xf0]  ;;  %v3995_v17 = vor.u32 %v4876_v6, %v3992_v10  ;;  %v3848_v20 = vld [vmem:[#allocation2 + $0x5b0] sm:$0xf0]  ;;  %v4872_v21 = vld [vmem:[#allocation2 + $0x6a4] sm:$0xf] }
  0x62   :  { %1574 = vmatpush.bf16.msra.mxu3 %v3691_v19  ;;  %v4840_v19 = vld [vmem:[#allocation2 + $0x5a4] sm:$0xf]  ;;  %v3359_v22 = vor.u32 %v4719_v14, %v3358_v13  ;;  %v3976_v23 = vld [vmem:[#allocation2 + $0x6b0] sm:$0xf0]  ;;  %v4675_v53 = vld [vmem:[#allocation2 + $0x74] sm:$0xf0] }
  0x63   :  { %1536 = vmatpush.bf16.msra.mxu0 %v3291_v26  ;;  %v4683_v26 = vld [vmem:[#allocation2 + $0xb4] sm:$0xf0]  ;;  %v3851_v29 = vor.u32 %v4840_v19, %v3848_v20  ;;  %v3979_v30 = vor.u32 %v4872_v21, %v3976_v23  ;;  %v3832_v34 = vld [vmem:[#allocation2 + $0x590] sm:$0xf0]  ;;  %v4868_v35 = vld [vmem:[#allocation2 + $0x684] sm:$0xf]  ;;  %v3183_v58 = vor.u32 %v4675_v53, %v3182_v52 }
  0x64   :  { %1549 = vmatpush.bf16.msra.mxu1 %v3419_v27  ;;  %v3342_v27 = vld [vmem:[#allocation2 + $0x1a8] sm:$0xf]  ;;  %v3215_v31 = vor.u32 %v4683_v26, %v3214_v24  ;;  %v3960_v39 = vld [vmem:[#allocation2 + $0x690] sm:$0xf0]  ;;  %v4832_v47 = vld [vmem:[#allocation2 + $0x564] sm:$0xf] }
  0x65   :  { %1562 = vmatpush.bf16.msra.mxu2 %v3547_v28  ;;  %v4715_v28 = vld [vmem:[#allocation2 + $0x1b4] sm:$0xf0]  ;;  %v3816_v48 = vld [vmem:[#allocation2 + $0x570] sm:$0xf0]  ;;  %v3310_v54 = vld [vmem:[#allocation2 + $0x168] sm:$0xf] }
  0x66   :  { %1575 = vmatpush.bf16.msra.mxu3 %v3675_v32  ;;  %v4836_v32 = vld [vmem:[#allocation2 + $0x584] sm:$0xf]  ;;  %v3343_v38 = vor.u32 %v4715_v28, %v3342_v27  ;;  %v3944_v51 = vld [vmem:[#allocation2 + $0x670] sm:$0xf0]  ;;  %v4707_v55 = vld [vmem:[#allocation2 + $0x174] sm:$0xf0] }
  0x67   :  { %1537 = vmatpush.bf16.msra.mxu0 %v3275_v41  ;;  %v4679_v41 = vld [vmem:[#allocation2 + $0x94] sm:$0xf0]  ;;  %v4828_v59 = vld [vmem:[#allocation2 + $0x544] sm:$0xf]  ;;  %v3311_v62 = vor.u32 %v4707_v55, %v3310_v54  ;;  %v3928_v63 = vld [vmem:[#allocation2 + $0x650] sm:$0xf0] }
  0x68   :  { %1550 = vmatpush.bf16.msra.mxu1 %v3403_v44  ;;  %v3835_v44 = vor.u32 %v4836_v32, %v3832_v34  ;;  %v3199_v46 = vor.u32 %v4679_v41, %v3198_v40  ;;  %v3784_v10 = vld [vmem:[#allocation2 + $0x530] sm:$0xf0]  ;;  %v4856_v11 = vld [vmem:[#allocation2 + $0x624] sm:$0xf]  ;;  %v3150_v14 = vld [vmem:[#allocation2 + $0x28] sm:$0xf] }
  0x69   :  { %1563 = vmatpush.bf16.msra.mxu2 %v3531_v45  ;;  %v3963_v45 = vor.u32 %v4868_v35, %v3960_v39  ;;  %v3912_v13 = vld [vmem:[#allocation2 + $0x630] sm:$0xf0]  ;;  %v4820_v20 = vld [vmem:[#allocation2 + $0x504] sm:$0xf]  ;;  %v3134_v27 = vld [vmem:[#allocation2 + $0x8] sm:$0xf] }
  0x6a   :  { %1576 = vmatpush.bf16.msra.mxu3 %v3659_v49  ;;  %v4864_v49 = vld [vmem:[#allocation2 + $0x664] sm:$0xf]  ;;  %v3768_v21 = vld [vmem:[#allocation2 + $0x510] sm:$0xf0]  ;;  %v3502_v32 = vld [vmem:[#allocation2 + $0x2e8] sm:$0xf] }
  0x6b   :  { %1538 = vmatpush.bf16.msra.mxu0 %v3259_v56  ;;  %v3819_v56 = vor.u32 %v4832_v47, %v3816_v48  ;;  %v3947_v57 = vor.u32 %v4864_v49, %v3944_v51  ;;  %v4852_v24 = vld [vmem:[#allocation2 + $0x604] sm:$0xf]  ;;  %v3896_v26 = vld [vmem:[#allocation2 + $0x610] sm:$0xf0]  ;;  %v4755_v34 = vld [vmem:[#allocation2 + $0x2f4] sm:$0xf0] }
  0x6c   :  { %1551 = vmatpush.bf16.msra.mxu1 %v3387_v60  ;;  %v3800_v60 = vld [vmem:[#allocation2 + $0x550] sm:$0xf0]  ;;  %v3630_v35 = vld [vmem:[#allocation2 + $0x3e8] sm:$0xf]  ;;  %v4787_v39 = vld [vmem:[#allocation2 + $0x3f4] sm:$0xf0]  ;;  %v3899_v42 = vor.u32 %v4852_v24, %v3896_v26  ;;  %v3503_v47 = vor.u32 %v4755_v34, %v3502_v32 }
  0x6d   :  { %1564 = vmatpush.bf16.msra.mxu2 %v3515_v61  ;;  %v4860_v61 = vld [vmem:[#allocation2 + $0x644] sm:$0xf]  ;;  %v3803_v4 = vor.u32 %v4828_v59, %v3800_v60  ;;  %v3758_v40 = vld [vmem:[#allocation2 + $0x4e8] sm:$0xf]  ;;  %v4819_v41 = vld [vmem:[#allocation2 + $0x4f4] sm:$0xf0]  ;;  %v3631_v48 = vor.u32 %v4787_v39, %v3630_v35 }
  0x6e   :  { %1577 = vmatpush.bf16.msra.mxu3 %v3643_v0  ;;  %1539 = vmatmul.bf16.vlgmr.msra.gmra.mxu0 %v5201_v25  ;;  %v3166_v0 = vld [vmem:[#allocation2 + $0x48] sm:$0xf]  ;;  %v3931_v5 = vor.u32 %v4860_v61, %v3928_v63  ;;  %v3759_v49 = vor.u32 %v4819_v41, %v3758_v40  ;;  %v4751_v51 = vld [vmem:[#allocation2 + $0x2d4] sm:$0xf0] }
  0x6f   :  { %1583 = vmatpush.bf16.msrb.mxu0 %v3883_v1  ;;  %1552 = vmatmul.bf16.vlgmr.msra.gmra.mxu1 %v5186_v8  ;;  %v4671_v1 = vld [vmem:[#allocation2 + $0x54] sm:$0xf0]  ;;  %v3614_v52 = vld [vmem:[#allocation2 + $0x3c8] sm:$0xf] }
  0x70   :  { %1596 = vmatpush.bf16.msrb.mxu1 %v4011_v2  ;;  %1565 = vmatmul.bf16.vlgmr.msra.gmra.mxu2 %v5193_v15  ;;  %v3294_v2 = vld [vmem:[#allocation2 + $0x148] sm:$0xf]  ;;  %v3167_v6 = vor.u32 %v4671_v1, %v3166_v0  ;;  %v4783_v54 = vld [vmem:[#allocation2 + $0x3d4] sm:$0xf0] }
  0x71   :  { %1609 = vmatpush.bf16.msrb.mxu2 %v3247_v3  ;;  %1578 = vmatmul.bf16.vlgmr.msra.gmra.mxu3 %v5215_v36  ;;  %v4703_v3 = vld [vmem:[#allocation2 + $0x154] sm:$0xf0]  ;;  %v3742_v55 = vld [vmem:[#allocation2 + $0x4c8] sm:$0xf]  ;;  %v3615_v60 = vor.u32 %v4783_v54, %v3614_v52 }
  0x72   :  { %1622 = vmatpush.bf16.msrb.mxu3 %v3375_v7  ;;  %v4824_v7 = vld [vmem:[#allocation2 + $0x524] sm:$0xf]  ;;  %v3295_v12 = vor.u32 %v4703_v3, %v3294_v2  ;;  %v4747_v63 = vld [vmem:[#allocation2 + $0x2b4] sm:$0xf0]  ;;  %v3598_v0 = vld [vmem:[#allocation2 + $0x3a8] sm:$0xf] }
  0x73   :  { %1584 = vmatpush.bf16.msrb.mxu0 %v3867_v16  ;;  %v4667_v16 = vld [vmem:[#allocation2 + $0x34] sm:$0xf0]  ;;  %v3787_v19 = vor.u32 %v4824_v7, %v3784_v10  ;;  %v3726_v3 = vld [vmem:[#allocation2 + $0x4a8] sm:$0xf] }
  0x74   :  { %1597 = vmatpush.bf16.msrb.mxu1 %v3995_v17  ;;  %v3278_v17 = vld [vmem:[#allocation2 + $0x128] sm:$0xf]  ;;  %v3151_v23 = vor.u32 %v4667_v16, %v3150_v14  ;;  %v4779_v2 = vld [vmem:[#allocation2 + $0x3b4] sm:$0xf0] }
  0x75   :  { %1610 = vmatpush.bf16.msrb.mxu2 %v3231_v18  ;;  %v4699_v18 = vld [vmem:[#allocation2 + $0x134] sm:$0xf0]  ;;  %v3599_v10 = vor.u32 %v4779_v2, %v3598_v0  ;;  %v3582_v14 = vld [vmem:[#allocation2 + $0x388] sm:$0xf] }
  0x76   :  { %1623 = vmatpush.bf16.msrb.mxu3 %v3359_v22  ;;  %v3915_v22 = vor.u32 %v4856_v11, %v3912_v13  ;;  %v3279_v28 = vor.u32 %v4699_v18, %v3278_v17  ;;  %v4743_v13 = vld [vmem:[#allocation2 + $0x294] sm:$0xf0]  ;;  %v3710_v18 = vld [vmem:[#allocation2 + $0x488] sm:$0xf] }
  0x77   :  { %1585 = vmatpush.bf16.msrb.mxu0 %v3851_v29  ;;  %v4663_v29 = vld [vmem:[#allocation2 + $0x14] sm:$0xf0]  ;;  %v3438_v26 = vld [vmem:[#allocation2 + $0x268] sm:$0xf] }
  0x78   :  { %1598 = vmatpush.bf16.msrb.mxu1 %v3979_v30  ;;  %v3262_v30 = vld [vmem:[#allocation2 + $0x108] sm:$0xf]  ;;  %v3135_v43 = vor.u32 %v4663_v29, %v3134_v27  ;;  %v4775_v17 = vld [vmem:[#allocation2 + $0x394] sm:$0xf0] }
  0x79   :  { %1611 = vmatpush.bf16.msrb.mxu2 %v3215_v31  ;;  %v4695_v31 = vld [vmem:[#allocation2 + $0x114] sm:$0xf0]  ;;  %v3822_v34 = vld [vmem:[#allocation2 + $0x568] sm:$0xf] }
  0x7a   :  { %1624 = vmatpush.bf16.msrb.mxu3 %v3343_v38  ;;  %v3771_v38 = vor.u32 %v4820_v20, %v3768_v21  ;;  %v3838_v20 = vld [vmem:[#allocation2 + $0x588] sm:$0xf]  ;;  %v4839_v21 = vld [vmem:[#allocation2 + $0x594] sm:$0xf0] }
  0x7b   :  { %1586 = vmatpush.bf16.msrb.mxu0 %v3835_v44  ;;  %v3886_v44 = vld [vmem:[#allocation2 + $0x5e8] sm:$0xf]  ;;  %v4739_v27 = vld [vmem:[#allocation2 + $0x274] sm:$0xf0]  ;;  %v3839_v29 = vor.u32 %v4839_v21, %v3838_v20 }
  0x7c   :  { %1599 = vmatpush.bf16.msrb.mxu1 %v3963_v45  ;;  %v4851_v45 = vld [vmem:[#allocation2 + $0x5f4] sm:$0xf0]  ;;  %v3422_v41 = vld [vmem:[#allocation2 + $0x248] sm:$0xf] }
  0x7d   :  { %1612 = vmatpush.bf16.msrb.mxu2 %v3199_v46  ;;  %v3263_v46 = vor.u32 %v4695_v31, %v3262_v30  ;;  %v3887_v53 = vor.u32 %v4851_v45, %v3886_v44  ;;  %v4771_v30 = vld [vmem:[#allocation2 + $0x374] sm:$0xf0]  ;;  %v3694_v31 = vld [vmem:[#allocation2 + $0x468] sm:$0xf] }
  0x7e   :  { %1625 = vmatpush.bf16.msrb.mxu3 %v3327_v50  ;;  %v3486_v50 = vld [vmem:[#allocation2 + $0x2c8] sm:$0xf]  ;;  %v4803_v32 = vld [vmem:[#allocation2 + $0x474] sm:$0xf0] }
  0x7f   :  { %1587 = vmatpush.bf16.msrb.mxu0 %v3819_v56  ;;  %v4815_v56 = vld [vmem:[#allocation2 + $0x4d4] sm:$0xf0]  ;;  %v3487_v59 = vor.u32 %v4751_v51, %v3486_v50  ;;  %v3695_v40 = vor.u32 %v4803_v32, %v3694_v31  ;;  %v4685_v31 = vld [vmem:[#allocation2 + $0xcc] sm:$0xf] }
  0x80   :  { %1600 = vmatpush.bf16.msrb.mxu1 %v3947_v57  ;;  %v3870_v57 = vld [vmem:[#allocation2 + $0x5c8] sm:$0xf]  ;;  %v3743_v61 = vor.u32 %v4815_v56, %v3742_v55  ;;  %v4835_v35 = vld [vmem:[#allocation2 + $0x574] sm:$0xf0] }
  0x81   :  { %1613 = vmatpush.bf16.msrb.mxu2 %v3183_v58  ;;  %v4847_v58 = vld [vmem:[#allocation2 + $0x5d4] sm:$0xf0]  ;;  %v3823_v44 = vor.u32 %v4835_v35, %v3822_v34  ;;  %v3534_v55 = vld [vmem:[#allocation2 + $0x328] sm:$0xf]  ;;  %v3232_v34 = vld [vmem:[#allocation2 + $0xd8] sm:$0xf0] }
  0x82   :  { %1626 = vmatpush.bf16.msrb.mxu3 %v3311_v62  ;;  %v3470_v62 = vld [vmem:[#allocation2 + $0x2a8] sm:$0xf]  ;;  %v3871_v1 = vor.u32 %v4847_v58, %v3870_v57  ;;  %v4767_v45 = vld [vmem:[#allocation2 + $0x354] sm:$0xf0]  ;;  %v4717_v35 = vld [vmem:[#allocation2 + $0x1cc] sm:$0xf] }
  0x83   :  { %1588 = vmatpush.bf16.msrb.mxu0 %v3803_v4  ;;  %v4811_v4 = vld [vmem:[#allocation2 + $0x4b4] sm:$0xf0]  ;;  %v3471_v7 = vor.u32 %v4747_v63, %v3470_v62  ;;  %v3662_v58 = vld [vmem:[#allocation2 + $0x428] sm:$0xf] }
  0x84   :  { %1601 = vmatpush.bf16.msrb.mxu1 %v3931_v5  ;;  %v3854_v5 = vld [vmem:[#allocation2 + $0x5a8] sm:$0xf]  ;;  %v3727_v11 = vor.u32 %v4811_v4, %v3726_v3  ;;  %v4731_v54 = vld [vmem:[#allocation2 + $0x234] sm:$0xf0] }
  0x85   :  { %1614 = vmatpush.bf16.msrb.mxu2 %v3167_v6  ;;  %v4843_v6 = vld [vmem:[#allocation2 + $0x5b4] sm:$0xf0]  ;;  %v3390_v63 = vld [vmem:[#allocation2 + $0x208] sm:$0xf] }
  0x86   :  { %1627 = vmatpush.bf16.msrb.mxu3 %v3295_v12  ;;  %v3454_v12 = vld [vmem:[#allocation2 + $0x288] sm:$0xf]  ;;  %v3855_v16 = vor.u32 %v4843_v6, %v3854_v5  ;;  %v4763_v57 = vld [vmem:[#allocation2 + $0x334] sm:$0xf0] }
  0x87   :  { %1589 = vmatpush.bf16.msrb.mxu0 %v3787_v19  ;;  %v4807_v19 = vld [vmem:[#allocation2 + $0x494] sm:$0xf0]  ;;  %v3518_v3 = vld [vmem:[#allocation2 + $0x308] sm:$0xf] }
  0x88   :  { %1602 = vmatpush.bf16.msrb.mxu1 %v3915_v22  ;;  %v3455_v22 = vor.u32 %v4743_v13, %v3454_v12  ;;  %v3711_v24 = vor.u32 %v4807_v19, %v3710_v18  ;;  %v4727_v0 = vld [vmem:[#allocation2 + $0x214] sm:$0xf0]  ;;  %v3646_v5 = vld [vmem:[#allocation2 + $0x408] sm:$0xf]  ;;  %v4721_v18 = vld [vmem:[#allocation2 + $0x1ec] sm:$0xf] }
  0x89   :  { %1615 = vmatpush.bf16.msrb.mxu2 %v3151_v23  ;;  %v3583_v23 = vor.u32 %v4775_v17, %v3582_v14  ;;  %v4759_v4 = vld [vmem:[#allocation2 + $0x314] sm:$0xf0]  ;;  %v4014_v12 = vld [vmem:[#allocation2 + $0x6e8] sm:$0xf]  ;;  %v4689_v14 = vld [vmem:[#allocation2 + $0xec] sm:$0xf] }
  0x8a   :  { %1628 = vmatpush.bf16.msrb.mxu3 %v3279_v28  ;;  %v3566_v28 = vld [vmem:[#allocation2 + $0x368] sm:$0xf]  ;;  %v4883_v13 = vld [vmem:[#allocation2 + $0x6f4] sm:$0xf0]  ;;  %v3248_v17 = vld [vmem:[#allocation2 + $0xf8] sm:$0xf0]  ;;  %v3519_v20 = vor.u32 %v4759_v4, %v3518_v3 }
  0x8b   :  { %1590 = vmatpush.bf16.msrb.mxu0 %v3771_v38  ;;  %v3439_v38 = vor.u32 %v4739_v27, %v3438_v26  ;;  %v3567_v39 = vor.u32 %v4771_v30, %v3566_v28  ;;  %v3376_v19 = vld [vmem:[#allocation2 + $0x1f8] sm:$0xf0]  ;;  %v4015_v26 = vor.u32 %v4883_v13, %v4014_v12  ;;  %v3251_v27 = vor.u32 %v4689_v14, %v3248_v17  ;;  %v4879_v30 = vld [vmem:[#allocation2 + $0x6d4] sm:$0xf0]  ;;  %v3950_v4 = vld [vmem:[#allocation2 + $0x668] sm:$0xf] }
  0x8c   :  { %1603 = vmatpush.bf16.msrb.mxu1 %v3899_v42  ;;  %v4735_v42 = vld [vmem:[#allocation2 + $0x254] sm:$0xf0]  ;;  %v3379_v28 = vor.u32 %v4721_v18, %v3376_v19  ;;  %v3312_v12 = vld [vmem:[#allocation2 + $0x178] sm:$0xf0]  ;;  %v4737_v13 = vld [vmem:[#allocation2 + $0x26c] sm:$0xf] }
  0x8d   :  { %1616 = vmatpush.bf16.msrb.mxu2 %v3135_v43  ;;  %v3550_v43 = vld [vmem:[#allocation2 + $0x348] sm:$0xf]  ;;  %v3423_v50 = vor.u32 %v4735_v42, %v3422_v41  ;;  %v3235_v42 = vor.u32 %v4685_v31, %v3232_v34  ;;  %v3440_v14 = vld [vmem:[#allocation2 + $0x278] sm:$0xf0] }
  0x8e   :  { %1629 = vmatpush.bf16.msrb.mxu3 %v3263_v46  ;;  %1591 = vmatmul.bf16.vlgmr.msrb.gmra.mxu0 %v5217_v37  ;;  %v3678_v46 = vld [vmem:[#allocation2 + $0x448] sm:$0xf]  ;;  %v3551_v51 = vor.u32 %v4767_v45, %v3550_v43  ;;  %v4875_v45 = vld [vmem:[#allocation2 + $0x6b4] sm:$0xf0] }
  0x8f   :  { %1635 = vmatpush.bf16.msra.mxu0 %v3503_v47  ;;  %1604 = vmatmul.bf16.vlgmr.msrb.gmra.mxu1 %v5213_v33  ;;  %v4799_v47 = vld [vmem:[#allocation2 + $0x454] sm:$0xf0] }
  0x90   :  { %1648 = vmatpush.bf16.msra.mxu1 %v3631_v48  ;;  %1617 = vmatmul.bf16.vlgmr.msrb.gmra.mxu2 %v5188_v9  ;;  %v3806_v48 = vld [vmem:[#allocation2 + $0x548] sm:$0xf]  ;;  %v3679_v52 = vor.u32 %v4799_v47, %v3678_v46  ;;  %v4681_v46 = vld [vmem:[#allocation2 + $0xac] sm:$0xf] }
  0x91   :  { %1661 = vmatpush.bf16.msra.mxu2 %v3759_v49  ;;  %1630 = vmatmul.bf16.vlgmr.msrb.gmra.mxu3 %v5201_v25  ;;  %v4831_v49 = vld [vmem:[#allocation2 + $0x554] sm:$0xf0] }
  0x92   :  { %1674 = vmatpush.bf16.msra.mxu3 %v3887_v53  ;;  %v3406_v53 = vld [vmem:[#allocation2 + $0x228] sm:$0xf]  ;;  %v3807_v56 = vor.u32 %v4831_v49, %v3806_v48  ;;  %v3216_v48 = vld [vmem:[#allocation2 + $0xb8] sm:$0xf0]  ;;  %v4713_v49 = vld [vmem:[#allocation2 + $0x1ac] sm:$0xf] }
  0x93   :  { %1636 = vmatpush.bf16.msra.mxu0 %v3487_v59  ;;  %v4795_v59 = vld [vmem:[#allocation2 + $0x434] sm:$0xf0]  ;;  %v3407_v62 = vor.u32 %v4731_v54, %v3406_v53  ;;  %v3219_v54 = vor.u32 %v4681_v46, %v3216_v48  ;;  %v3408_v46 = vld [vmem:[#allocation2 + $0x238] sm:$0xf0] }
  0x94   :  { %1649 = vmatpush.bf16.msra.mxu1 %v3615_v60  ;;  %v3790_v60 = vld [vmem:[#allocation2 + $0x528] sm:$0xf]  ;;  %v3663_v2 = vor.u32 %v4795_v59, %v3662_v58  ;;  %v4677_v58 = vld [vmem:[#allocation2 + $0x8c] sm:$0xf] }
  0x95   :  { %1662 = vmatpush.bf16.msra.mxu2 %v3743_v61  ;;  %v4827_v61 = vld [vmem:[#allocation2 + $0x534] sm:$0xf0] }
  0x96   :  { %1675 = vmatpush.bf16.msra.mxu3 %v3871_v1  ;;  %v3535_v1 = vor.u32 %v4763_v57, %v3534_v55  ;;  %v3791_v6 = vor.u32 %v4827_v61, %v3790_v60  ;;  %v4871_v57 = vld [vmem:[#allocation2 + $0x694] sm:$0xf0]  ;;  %v3200_v60 = vld [vmem:[#allocation2 + $0x98] sm:$0xf0]  ;;  %v4709_v61 = vld [vmem:[#allocation2 + $0x18c] sm:$0xf] }
  0x97   :  { %1637 = vmatpush.bf16.msra.mxu0 %v3471_v7  ;;  %v4791_v7 = vld [vmem:[#allocation2 + $0x414] sm:$0xf0] }
  0x98   :  { %1650 = vmatpush.bf16.msra.mxu1 %v3599_v10  ;;  %v3774_v10 = vld [vmem:[#allocation2 + $0x508] sm:$0xf]  ;;  %v3647_v21 = vor.u32 %v4791_v7, %v3646_v5  ;;  %v4867_v5 = vld [vmem:[#allocation2 + $0x674] sm:$0xf0] }
  0x99   :  { %1663 = vmatpush.bf16.msra.mxu2 %v3727_v11  ;;  %v4823_v11 = vld [vmem:[#allocation2 + $0x514] sm:$0xf0] }
  0x9a   :  { %1676 = vmatpush.bf16.msra.mxu3 %v3855_v16  ;;  %v3391_v16 = vor.u32 %v4727_v0, %v3390_v63  ;;  %v4741_v63 = vld [vmem:[#allocation2 + $0x28c] sm:$0xf]  ;;  %v3456_v0 = vld [vmem:[#allocation2 + $0x298] sm:$0xf0] }
  0x9b   :  { %1638 = vmatpush.bf16.msra.mxu0 %v3455_v22  ;;  %v4753_v22 = vld [vmem:[#allocation2 + $0x2ec] sm:$0xf]  ;;  %v3459_v7 = vor.u32 %v4741_v63, %v3456_v0 }
  0x9c   :  { %1651 = vmatpush.bf16.msra.mxu1 %v3583_v23  ;;  %v3504_v23 = vld [vmem:[#allocation2 + $0x2f8] sm:$0xf0]  ;;  %v4817_v63 = vld [vmem:[#allocation2 + $0x4ec] sm:$0xf] }
  0x9d   :  { %1664 = vmatpush.bf16.msra.mxu2 %v3711_v24  ;;  %v3775_v24 = vor.u32 %v4823_v11, %v3774_v10  ;;  %v3507_v32 = vor.u32 %v4753_v22, %v3504_v23  ;;  %v3184_v10 = vld [vmem:[#allocation2 + $0x78] sm:$0xf0]  ;;  %v4705_v11 = vld [vmem:[#allocation2 + $0x16c] sm:$0xf]  ;;  %v3443_v23 = vor.u32 %v4737_v13, %v3440_v14 }
  0x9e   :  { %1677 = vmatpush.bf16.msra.mxu3 %v3839_v29  ;;  %v3998_v29 = vld [vmem:[#allocation2 + $0x6c8] sm:$0xf]  ;;  %v3315_v19 = vor.u32 %v4705_v11, %v3312_v12  ;;  %v4669_v22 = vld [vmem:[#allocation2 + $0x4c] sm:$0xf] }
  0x9f   :  { %1639 = vmatpush.bf16.msra.mxu0 %v3439_v38  ;;  %v3360_v38 = vld [vmem:[#allocation2 + $0x1d8] sm:$0xf0]  ;;  %v3999_v41 = vor.u32 %v4879_v30, %v3998_v29 }
  0xa0   :  { %1652 = vmatpush.bf16.msra.mxu1 %v3567_v39  ;;  %v4749_v39 = vld [vmem:[#allocation2 + $0x2cc] sm:$0xf]  ;;  %v3363_v43 = vor.u32 %v4717_v35, %v3360_v38  ;;  %v3424_v29 = vld [vmem:[#allocation2 + $0x258] sm:$0xf0]  ;;  %v3918_v35 = vld [vmem:[#allocation2 + $0x628] sm:$0xf] }
  0xa1   :  { %1665 = vmatpush.bf16.msra.mxu2 %v3695_v40  ;;  %v3488_v40 = vld [vmem:[#allocation2 + $0x2d8] sm:$0xf0]  ;;  %v4859_v38 = vld [vmem:[#allocation2 + $0x634] sm:$0xf0] }
  0xa2   :  { %1678 = vmatpush.bf16.msra.mxu3 %v3823_v44  ;;  %v3982_v44 = vld [vmem:[#allocation2 + $0x6a8] sm:$0xf]  ;;  %v3491_v47 = vor.u32 %v4749_v39, %v3488_v40  ;;  %v4665_v39 = vld [vmem:[#allocation2 + $0x2c] sm:$0xf]  ;;  %v3919_v48 = vor.u32 %v4859_v38, %v3918_v35  ;;  %v3600_v35 = vld [vmem:[#allocation2 + $0x3b8] sm:$0xf0] }
  0xa3   :  { %1640 = vmatpush.bf16.msra.mxu0 %v3423_v50  ;;  %v3344_v50 = vld [vmem:[#allocation2 + $0x1b8] sm:$0xf0]  ;;  %v3983_v53 = vor.u32 %v4875_v45, %v3982_v44  ;;  %v4729_v45 = vld [vmem:[#allocation2 + $0x22c] sm:$0xf] }
  0xa4   :  { %1653 = vmatpush.bf16.msra.mxu1 %v3551_v51  ;;  %v4745_v51 = vld [vmem:[#allocation2 + $0x2ac] sm:$0xf]  ;;  %v3347_v55 = vor.u32 %v4713_v49, %v3344_v50  ;;  %v3902_v49 = vld [vmem:[#allocation2 + $0x608] sm:$0xf]  ;;  %v4855_v50 = vld [vmem:[#allocation2 + $0x614] sm:$0xf0] }
  0xa5   :  { %1666 = vmatpush.bf16.msra.mxu2 %v3679_v52  ;;  %v3472_v52 = vld [vmem:[#allocation2 + $0x2b8] sm:$0xf0]  ;;  %v3903_v0 = vor.u32 %v4855_v50, %v3902_v49  ;;  %v4809_v38 = vld [vmem:[#allocation2 + $0x4ac] sm:$0xf] }
  0xa6   :  { %1679 = vmatpush.bf16.msra.mxu3 %v3807_v56  ;;  %v3966_v56 = vld [vmem:[#allocation2 + $0x688] sm:$0xf]  ;;  %v3475_v59 = vor.u32 %v4745_v51, %v3472_v52  ;;  %v4773_v50 = vld [vmem:[#allocation2 + $0x38c] sm:$0xf] }
  0xa7   :  { %1641 = vmatpush.bf16.msra.mxu0 %v3407_v62  ;;  %v3328_v62 = vld [vmem:[#allocation2 + $0x198] sm:$0xf0] }
  0xa8   :  { %1654 = vmatpush.bf16.msra.mxu1 %v3535_v1  ;;  %v3967_v1 = vor.u32 %v4871_v57, %v3966_v56  ;;  %v3331_v3 = vor.u32 %v4709_v61, %v3328_v62  ;;  %v4693_v56 = vld [vmem:[#allocation2 + $0x10c] sm:$0xf]  ;;  %v3411_v57 = vor.u32 %v4729_v45, %v3408_v46  ;;  %v3632_v62 = vld [vmem:[#allocation2 + $0x3f8] sm:$0xf0] }
  0xa9   :  { %1667 = vmatpush.bf16.msra.mxu2 %v3663_v2  ;;  %v3203_v2 = vor.u32 %v4677_v58, %v3200_v60  ;;  %v3264_v58 = vld [vmem:[#allocation2 + $0x118] sm:$0xf0]  ;;  %v4785_v61 = vld [vmem:[#allocation2 + $0x3ec] sm:$0xf] }
  0xaa   :  { %1680 = vmatpush.bf16.msra.mxu3 %v3791_v6  ;;  %v4673_v6 = vld [vmem:[#allocation2 + $0x6c] sm:$0xf]  ;;  %v3392_v60 = vld [vmem:[#allocation2 + $0x218] sm:$0xf0]  ;;  %v3635_v12 = vor.u32 %v4785_v61, %v3632_v62 }
  0xab   :  { %1642 = vmatpush.bf16.msra.mxu0 %v3391_v16  ;;  %v3951_v16 = vor.u32 %v4867_v5, %v3950_v4  ;;  %v3187_v18 = vor.u32 %v4673_v6, %v3184_v10  ;;  %v3267_v6 = vor.u32 %v4693_v56, %v3264_v58  ;;  %v4016_v10 = vld [vmem:[#allocation2 + $0x6f8] sm:$0xf0]  ;;  %v4869_v56 = vld [vmem:[#allocation2 + $0x68c] sm:$0xf] }
  0xac   :  { %1655 = vmatpush.bf16.msra.mxu1 %v3519_v20  ;;  %v3934_v20 = vld [vmem:[#allocation2 + $0x648] sm:$0xf]  ;;  %v5237_v31 = vpop.f32.mrf.mxu1  ;;  %v3984_v45 = vld [vmem:[#allocation2 + $0x6b8] sm:$0xf0]  ;;  %v4769_v61 = vld [vmem:[#allocation2 + $0x36c] sm:$0xf] }
  0xad   :  { %1668 = vmatpush.bf16.msra.mxu2 %v3647_v21  ;;  %v4863_v21 = vld [vmem:[#allocation2 + $0x654] sm:$0xf0]  ;;  %v3568_v62 = vld [vmem:[#allocation2 + $0x378] sm:$0xf0] }
  0xae   :  { %1681 = vmatpush.bf16.msra.mxu3 %v3775_v24  ;;  %1643 = vmatmul.bf16.vlgmr.msra.gmra.mxu0 %v5186_v8  ;;  %v3168_v24 = vld [vmem:[#allocation2 + $0x58] sm:$0xf0]  ;;  %v3935_v30 = vor.u32 %v4863_v21, %v3934_v20  ;;  %v4813_v20 = vld [vmem:[#allocation2 + $0x4cc] sm:$0xf] }
  0xaf   :  { %1687 = vmatpush.bf16.msrb.mxu0 %v4015_v26  ;;  %1656 = vmatmul.bf16.vlgmr.msra.gmra.mxu1 %v5193_v15  ;;  %v4701_v26 = vld [vmem:[#allocation2 + $0x14c] sm:$0xf] }
  0xb0   :  { %1700 = vmatpush.bf16.msrb.mxu1 %v3251_v27  ;;  %1669 = vmatmul.bf16.vlgmr.msra.gmra.mxu2 %v5215_v36  ;;  %v3296_v27 = vld [vmem:[#allocation2 + $0x158] sm:$0xf0] }
  0xb1   :  { %1713 = vmatpush.bf16.msrb.mxu2 %v3379_v28  ;;  %1682 = vmatmul.bf16.vlgmr.msra.gmra.mxu3 %v5217_v37  ;;  %v4733_v28 = vld [vmem:[#allocation2 + $0x24c] sm:$0xf]  ;;  %v3299_v34 = vor.u32 %v4701_v26, %v3296_v27  ;;  %v3872_v26 = vld [vmem:[#allocation2 + $0x5d8] sm:$0xf0] }
  0xb2   :  { %1726 = vmatpush.bf16.msrb.mxu3 %v3507_v32  ;;  %v3171_v32 = vor.u32 %v4669_v22, %v3168_v24  ;;  %v3427_v40 = vor.u32 %v4733_v28, %v3424_v29  ;;  %v4845_v24 = vld [vmem:[#allocation2 + $0x5cc] sm:$0xf]  ;;  %v4000_v28 = vld [vmem:[#allocation2 + $0x6d8] sm:$0xf0] }
  0xb3   :  { %1688 = vmatpush.bf16.msrb.mxu0 %v3999_v41  ;;  %v3152_v41 = vld [vmem:[#allocation2 + $0x38] sm:$0xf0]  ;;  %v4877_v27 = vld [vmem:[#allocation2 + $0x6cc] sm:$0xf] }
  0xb4   :  { %1701 = vmatpush.bf16.msrb.mxu1 %v3235_v42  ;;  %v4697_v42 = vld [vmem:[#allocation2 + $0x12c] sm:$0xf]  ;;  %v3155_v52 = vor.u32 %v4665_v39, %v3152_v41  ;;  %v1451_v4 = vpop.f32.mrf.mxu1  ;;  %v4003_v39 = vor.u32 %v4877_v27, %v4000_v28 }
  0xb5   :  { %1714 = vmatpush.bf16.msrb.mxu2 %v3363_v43  ;;  %v3280_v43 = vld [vmem:[#allocation2 + $0x138] sm:$0xf0]  ;;  %v4841_v41 = vld [vmem:[#allocation2 + $0x5ac] sm:$0xf] }
  0xb6   :  { %1727 = vmatpush.bf16.msrb.mxu3 %v3491_v47  ;;  %v5235_v17 = vpop.f32.mrf.mxu0  ;;  %v5241_v47 = vpop.f32.mrf.mxu3  ;;  %v4865_v4 = vld [vmem:[#allocation2 + $0x66c] sm:$0xf] }
  0xb7   :  { %1689 = vmatpush.bf16.msrb.mxu0 %v3983_v53  ;;  %v3283_v53 = vor.u32 %v4697_v42, %v3280_v43  ;;  %v3856_v42 = vld [vmem:[#allocation2 + $0x5b8] sm:$0xf0]  ;;  %v4873_v43 = vld [vmem:[#allocation2 + $0x6ac] sm:$0xf] }
  0xb8   :  { %1702 = vmatpush.bf16.msrb.mxu1 %v3219_v54  ;;  %v4661_v54 = vld [vmem:[#allocation2 + $0xc] sm:$0xf]  ;;  %v3859_v49 = vor.u32 %v4841_v41, %v3856_v42  ;;  %v3792_v41 = vld [vmem:[#allocation2 + $0x538] sm:$0xf0] }
  0xb9   :  { %1715 = vmatpush.bf16.msrb.mxu2 %v3347_v55  ;;  %v3136_v55 = vld [vmem:[#allocation2 + $0x18] sm:$0xf0]  ;;  %v4857_v42 = vld [vmem:[#allocation2 + $0x62c] sm:$0xf] }
  0xba   :  { %1728 = vmatpush.bf16.msrb.mxu3 %v3475_v59  ;;  %v4725_v59 = vld [vmem:[#allocation2 + $0x20c] sm:$0xf]  ;;  %v3139_v5 = vor.u32 %v4661_v54, %v3136_v55  ;;  %v3712_v54 = vld [vmem:[#allocation2 + $0x498] sm:$0xf0] }
  0xbb   :  { %1690 = vmatpush.bf16.msrb.mxu0 %v3967_v1  ;;  %v5239_v44 = vpop.f32.mrf.mxu2  ;;  %v3760_v1 = vld [vmem:[#allocation2 + $0x4f8] sm:$0xf0]  ;;  %v3395_v11 = vor.u32 %v4725_v59, %v3392_v60  ;;  %v4837_v55 = vld [vmem:[#allocation2 + $0x58c] sm:$0xf] }
  0xbc   :  { %1703 = vmatpush.bf16.msrb.mxu1 %v3203_v2  ;;  %v4849_v2 = vld [vmem:[#allocation2 + $0x5ec] sm:$0xf]  ;;  %v3763_v14 = vor.u32 %v4817_v63, %v3760_v1  ;;  %v3696_v1 = vld [vmem:[#allocation2 + $0x478] sm:$0xf0] }
  0xbd   :  { %1716 = vmatpush.bf16.msrb.mxu2 %v3331_v3  ;;  %v3888_v3 = vld [vmem:[#allocation2 + $0x5f8] sm:$0xf0]  ;;  %v4801_v63 = vld [vmem:[#allocation2 + $0x46c] sm:$0xf] }
  0xbe   :  { %1729 = vmatpush.bf16.msrb.mxu3 %v3459_v7  ;;  %v1438_v51 = vpop.f32.mrf.mxu0  ;;  %v4881_v7 = vld [vmem:[#allocation2 + $0x6ec] sm:$0xf]  ;;  %v1477_v21 = vpop.f32.mrf.mxu3 }
  0xbf   :  { %1691 = vmatpush.bf16.msrb.mxu0 %v3951_v16  ;;  %v3891_v16 = vor.u32 %v4849_v2, %v3888_v3  ;;  %v4019_v22 = vor.u32 %v4881_v7, %v4016_v10  ;;  %v3584_v51 = vld [vmem:[#allocation2 + $0x398] sm:$0xf0]  ;;  %v4833_v2 = vld [vmem:[#allocation2 + $0x56c] sm:$0xf]  ;;  %v3699_v7 = vor.u32 %v4801_v63, %v3696_v1  ;;  %v4262_v63 = vld [vmem:[#allocation5 + $0x1e0] sm:$0xf] }
  0xc0   :  { %1704 = vmatpush.bf16.msrb.mxu1 %v3187_v18  ;;  %v4781_v18 = vld [vmem:[#allocation2 + $0x3cc] sm:$0xf]  ;;  %v3824_v3 = vld [vmem:[#allocation2 + $0x578] sm:$0xf0] }
  0xc1   :  { %1717 = vmatpush.bf16.msrb.mxu2 %v3315_v19  ;;  %v3616_v19 = vld [vmem:[#allocation2 + $0x3d8] sm:$0xf0]  ;;  %v3827_v10 = vor.u32 %v4833_v2, %v3824_v3  ;;  %v4861_v21 = vld [vmem:[#allocation2 + $0x64c] sm:$0xf] }
  0xc2   :  { %1730 = vmatpush.bf16.msrb.mxu3 %v3443_v23  ;;  %v3744_v23 = vld [vmem:[#allocation2 + $0x4d8] sm:$0xf0]  ;;  %v3619_v29 = vor.u32 %v4781_v18, %v3616_v19  ;;  %v4829_v19 = vld [vmem:[#allocation2 + $0x54c] sm:$0xf] }
  0xc3   :  { %1692 = vmatpush.bf16.msrb.mxu0 %v3935_v30  ;;  %v1464_v13 = vpop.f32.mrf.mxu2  ;;  %v3747_v30 = vor.u32 %v4813_v20, %v3744_v23  ;;  %v3680_v18 = vld [vmem:[#allocation2 + $0x458] sm:$0xf0] }
  0xc4   :  { %1705 = vmatpush.bf16.msrb.mxu1 %v3171_v32  ;;  %v3875_v32 = vor.u32 %v4845_v24, %v3872_v26  ;;  %v4797_v13 = vld [vmem:[#allocation2 + $0x44c] sm:$0xf]  ;;  %v3808_v20 = vld [vmem:[#allocation2 + $0x558] sm:$0xf0]  ;;  %v5258_v24 = vld [vmem:[%s5457_s2] sm:$0xf] }
  0xc5   :  { %1718 = vmatpush.bf16.msrb.mxu2 %v3299_v34  ;;  %v4777_v34 = vld [vmem:[#allocation2 + $0x3ac] sm:$0xf] }
  0xc6   :  { %1731 = vmatpush.bf16.msrb.mxu3 %v3427_v40  ;;  %v3728_v40 = vld [vmem:[#allocation2 + $0x4b8] sm:$0xf0]  ;;  %v3603_v46 = vor.u32 %v4777_v34, %v3600_v35  ;;  %v4793_v35 = vld [vmem:[#allocation2 + $0x42c] sm:$0xf] }
  0xc7   :  { %1693 = vmatpush.bf16.msrb.mxu0 %v3919_v48  ;;  %v3731_v48 = vor.u32 %v4809_v38, %v3728_v40  ;;  %v3536_v34 = vld [vmem:[#allocation2 + $0x338] sm:$0xf0]  ;;  %v4825_v40 = vld [vmem:[#allocation2 + $0x52c] sm:$0xf] }
  0xc8   :  { %1706 = vmatpush.bf16.msrb.mxu1 %v3155_v52  ;;  %v4805_v52 = vld [vmem:[#allocation2 + $0x48c] sm:$0xf] }
  0xc9   :  { %1719 = vmatpush.bf16.msrb.mxu2 %v3283_v53  ;;  %v3987_v53 = vor.u32 %v4873_v43, %v3984_v45  ;;  %v3920_v43 = vld [vmem:[#allocation2 + $0x638] sm:$0xf0]  ;;  %v299_v45 = vperm.slane %v5258_v24, 0 }
  0xca   :  { %1732 = vmatpush.bf16.msrb.mxu3 %v3411_v57  ;;  %v3968_v57 = vld [vmem:[#allocation2 + $0x698] sm:$0xf0] }
  0xcb   :  { %1694 = vmatpush.bf16.msrb.mxu0 %v3903_v0  ;;  %v5247_v58 = vpop.f32.mrf.mxu0  ;;  %v3971_v0 = vor.u32 %v4869_v56, %v3968_v57  ;;  %v3776_v56 = vld [vmem:[#allocation2 + $0x518] sm:$0xf0]  ;;  %v4853_v57 = vld [vmem:[#allocation2 + $0x60c] sm:$0xf] }
  0xcc   :  { %1707 = vmatpush.bf16.msrb.mxu1 %v3139_v5  ;;  %v5249_v59 = vpop.f32.mrf.mxu1  ;;  %v3952_v5 = vld [vmem:[#allocation2 + $0x678] sm:$0xf0] }
  0xcd   :  { %1720 = vmatpush.bf16.msrb.mxu2 %v3267_v6  ;;  %v3571_v6 = vor.u32 %v4769_v61, %v3568_v62 }
  0xce   :  { %1733 = vmatpush.bf16.msrb.mxu3 %v3395_v11  ;;  %1695 = vmatmul.bf16.vlgmr.msrb.gmra.mxu0 %v5213_v33  ;;  %v4765_v11 = vld [vmem:[#allocation2 + $0x34c] sm:$0xf] }
  0xcf   :  { %1739 = vmatpush.bf16.msra.mxu0 %v3635_v12  ;;  %1708 = vmatmul.bf16.vlgmr.msrb.gmra.mxu1 %v5188_v9  ;;  %v3715_v9 = vor.u32 %v4805_v52, %v3712_v54  ;;  %v3552_v12 = vld [vmem:[#allocation2 + $0x358] sm:$0xf0]  ;;  %v4789_v52 = vld [vmem:[#allocation2 + $0x40c] sm:$0xf] }
  0xd0   :  { %1752 = vmatpush.bf16.msra.mxu1 %v3763_v14  ;;  %1721 = vmatmul.bf16.vlgmr.msrb.gmra.mxu2 %v5201_v25  ;;  %v3840_v25 = vld [vmem:[#allocation2 + $0x598] sm:$0xf0]  ;;  %v3555_v26 = vor.u32 %v4765_v11, %v3552_v12  ;;  %v4246_v11 = vld [vmem:[#allocation5 + $0x1c0] sm:$0xf]  ;;  %v4942_v12 = vld [vmem:[#allocation5 + $0x1cc] sm:$0xf0] }
  0xd1   :  { %1765 = vmatpush.bf16.msra.mxu2 %v3891_v16  ;;  %1734 = vmatmul.bf16.vlgmr.msrb.gmra.mxu3 %v5186_v8  ;;  %v3587_v8 = vor.u32 %v4773_v50, %v3584_v51  ;;  %v3843_v60 = vor.u32 %v4837_v55, %v3840_v25  ;;  %v3955_v16 = vor.u32 %v4865_v4, %v3952_v5  ;;  %v3520_v51 = vld [vmem:[#allocation2 + $0x318] sm:$0xf0]  ;;  %v4821_v25 = vld [vmem:[#allocation2 + $0x50c] sm:$0xf] }
  0xd2   :  { %1778 = vmatpush.bf16.msra.mxu3 %v4019_v22  ;;  %v3936_v22 = vld [vmem:[#allocation2 + $0x658] sm:$0xf0]  ;;  %v3795_v50 = vor.u32 %v4825_v40, %v3792_v41  ;;  %v3923_v55 = vor.u32 %v4857_v42, %v3920_v43  ;;  %v3779_v2 = vor.u32 %v4821_v25, %v3776_v56  ;;  %v1437_v5 = vadd.f32 %v5235_v17, %v299_v45  ;;  %v4230_v17 = vld [vmem:[#allocation5 + $0x1a0] sm:$0xf]  ;;  %v4894_v43 = vld [vmem:[#allocation5 + $0x4c] sm:$0xf0] }
  0xd3   :  { %1740 = vmatpush.bf16.msra.mxu0 %v3619_v29  ;;  %v5251_v14 = vpop.f32.mrf.mxu2  ;;  %v1490_v27 = vpop.f32.mrf.mxu0  ;;  %v3683_v29 = vor.u32 %v4797_v13, %v3680_v18  ;;  %v3939_v38 = vor.u32 %v4861_v21, %v3936_v22  ;;  %v4247_v18 = vor.u32 %v4942_v12, %v4246_v11  ;;  %v4938_v21 = vld [vmem:[#allocation5 + $0x1ac] sm:$0xf0]  ;;  %v4054_v40 = vld [vmem:[#allocation5 + $0x40] sm:$0xf]  ;;  %v4912_v11 = vld [vmem:[#allocation5 + $0xe4] sm:$0xf] }
  0xd4   :  { %1753 = vmatpush.bf16.msra.mxu1 %v3747_v30  ;;  %v5253_v23 = vpop.f32.mrf.mxu3  ;;  %v1503_v28 = vpop.f32.mrf.mxu1  ;;  %v3811_v30 = vor.u32 %v4829_v19, %v3808_v20  ;;  %v4102_v19 = vld [vmem:[#allocation5 + $0xa0] sm:$0xf]  ;;  %v4906_v20 = vld [vmem:[#allocation5 + $0xac] sm:$0xf0]  ;;  %v4136_v12 = vld [vmem:[#allocation5 + $0xf0] sm:$0xf0] }
  0xd5   :  { %1766 = vmatpush.bf16.msra.mxu2 %v3875_v32  ;;  %v4761_v32 = vld [vmem:[#allocation2 + $0x32c] sm:$0xf]  ;;  %v4103_v22 = vor.u32 %v4906_v20, %v4102_v19  ;;  %v4086_v27 = vld [vmem:[#allocation5 + $0x80] sm:$0xf]  ;;  %v4902_v28 = vld [vmem:[#allocation5 + $0x8c] sm:$0xf0] }
  0xd6   :  { %1779 = vmatpush.bf16.msra.mxu3 %v4003_v39  ;;  %v3664_v39 = vld [vmem:[#allocation2 + $0x438] sm:$0xf0]  ;;  %v4890_v56 = vld [vmem:[#allocation5 + $0x2c] sm:$0xf0] }
  0xd7   :  { %1741 = vmatpush.bf16.msra.mxu0 %v3603_v46  ;;  %v3539_v46 = vor.u32 %v4761_v32, %v3536_v34  ;;  %v4070_v34 = vld [vmem:[#allocation5 + $0x60] sm:$0xf] }
  0xd8   :  { %1754 = vmatpush.bf16.msra.mxu1 %v3731_v48  ;;  %v4757_v48 = vld [vmem:[#allocation2 + $0x30c] sm:$0xf] }
  0xd9   :  { %1767 = vmatpush.bf16.msra.mxu2 %v3859_v49  ;;  %v3667_v49 = vor.u32 %v4793_v35, %v3664_v39  ;;  %v3523_v62 = vor.u32 %v4757_v48, %v3520_v51  ;;  %v4898_v35 = vld [vmem:[#allocation5 + $0x6c] sm:$0xf0]  ;;  %v4182_v48 = vld [vmem:[#allocation5 + $0x140] sm:$0xf] }
  0xda   :  { %1780 = vmatpush.bf16.msra.mxu3 %v3987_v53  ;;  %v3648_v53 = vld [vmem:[#allocation2 + $0x418] sm:$0xf0]  ;;  %v4930_v39 = vld [vmem:[#allocation5 + $0x16c] sm:$0xf0] }
  0xdb   :  { %1742 = vmatpush.bf16.msra.mxu0 %v3587_v8  ;;  %v1516_v54 = vpop.f32.mrf.mxu2  ;;  %v3904_v8 = vld [vmem:[#allocation2 + $0x618] sm:$0xf0]  ;;  %v3651_v1 = vor.u32 %v4789_v52, %v3648_v53  ;;  %v300_v52 = vperm.slane %v5258_v24, 1  ;;  %v4055_v53 = vor.u32 %v4894_v43, %v4054_v40 }
  0xdc   :  { %1755 = vmatpush.bf16.msra.mxu1 %v3715_v9  ;;  %v4134_v9 = vld [vmem:[#allocation5 + $0xe0] sm:$0xf]  ;;  %v1529_v61 = vpop.f32.mrf.mxu3  ;;  %v3907_v3 = vor.u32 %v4853_v57, %v3904_v8 }
  0xdd   :  { %1768 = vmatpush.bf16.msra.mxu2 %v3843_v60  ;;  %v4914_v60 = vld [vmem:[#allocation5 + $0xec] sm:$0xf0]  ;;  %v4038_v54 = vld [vmem:[#allocation5 + $0x20] sm:$0xf] }
  0xde   :  { %1781 = vmatpush.bf16.msra.mxu3 %v3971_v0  ;;  %v4946_v0 = vld [vmem:[#allocation5 + $0x1ec] sm:$0xf0]  ;;  %v4135_v4 = vor.u32 %v4914_v60, %v4134_v9  ;;  %v4374_v8 = vld [vmem:[#allocation5 + $0x2c0] sm:$0xf] }
  0xdf   :  { %1743 = vmatpush.bf16.msra.mxu0 %v3571_v6  ;;  %v4263_v6 = vor.u32 %v4946_v0, %v4262_v63  ;;  %v4974_v9 = vld [vmem:[#allocation5 + $0x2cc] sm:$0xf0]  ;;  %v4166_v60 = vld [vmem:[#allocation5 + $0x120] sm:$0xf]  ;;  %v1528_v63 = vadd.f32 %v5253_v23, %v300_v52  ;;  %v4039_v0 = vor.u32 %v4890_v56, %v4038_v54  ;;  %v4264_v23 = vld [vmem:[#allocation5 + $0x1f0] sm:$0xf0] }
  0xe0   :  { %1756 = vmatpush.bf16.msra.mxu1 %v3699_v7  ;;  %v4118_v7 = vld [vmem:[#allocation5 + $0xc0] sm:$0xf]  ;;  %v4922_v61 = vld [vmem:[#allocation5 + $0x12c] sm:$0xf0]  ;;  %v4216_v54 = vld [vmem:[#allocation5 + $0x190] sm:$0xf0] }
  0xe1   :  { %1769 = vmatpush.bf16.msra.mxu2 %v3827_v10  ;;  %v4910_v10 = vld [vmem:[#allocation5 + $0xcc] sm:$0xf0]  ;;  %v4294_v56 = vld [vmem:[#allocation5 + $0x220] sm:$0xf] }
  0xe2   :  { %1782 = vmatpush.bf16.msra.mxu3 %v3955_v16  ;;  %v4119_v13 = vor.u32 %v4910_v10, %v4118_v7  ;;  %v1450_v16 = vadd.f32 %v5237_v31, %v1437_v5  ;;  %v4231_v31 = vor.u32 %v4938_v21, %v4230_v17  ;;  %v4970_v7 = vld [vmem:[#allocation5 + $0x2ac] sm:$0xf0]  ;;  %v4139_v21 = vor.u32 %v4912_v11, %v4136_v12  ;;  %v4392_v11 = vld [vmem:[#allocation5 + $0x2f0] sm:$0xf0]  ;;  %v4924_v12 = vld [vmem:[#allocation5 + $0x144] sm:$0xf] }
  0xe3   :  { %1744 = vmatpush.bf16.msra.mxu0 %v3555_v26  ;;  %v4918_v10 = vld [vmem:[#allocation5 + $0x10c] sm:$0xf0] }
  0xe4   :  { %1757 = vmatpush.bf16.msra.mxu1 %v3683_v29  ;;  %v1463_v26 = vadd.f32 %v5239_v44, %v1450_v16  ;;  %v4934_v29 = vld [vmem:[#allocation5 + $0x18c] sm:$0xf0]  ;;  %v4071_v44 = vor.u32 %v4898_v35, %v4070_v34  ;;  %v4326_v34 = vld [vmem:[#allocation5 + $0x260] sm:$0xf] }
  0xe5   :  { %1770 = vmatpush.bf16.msra.mxu2 %v3811_v30  ;;  %v4087_v30 = vor.u32 %v4902_v28, %v4086_v27  ;;  %v4908_v27 = vld [vmem:[#allocation5 + $0xc4] sm:$0xf]  ;;  %v4120_v28 = vld [vmem:[#allocation5 + $0xd0] sm:$0xf0]  ;;  %v4962_v35 = vld [vmem:[#allocation5 + $0x26c] sm:$0xf0] }
  0xe6   :  { %1783 = vmatpush.bf16.msra.mxu3 %v3939_v38  ;;  %v4198_v38 = vld [vmem:[#allocation5 + $0x160] sm:$0xf]  ;;  %v4327_v40 = vor.u32 %v4962_v35, %v4326_v34  ;;  %v4916_v34 = vld [vmem:[#allocation5 + $0x104] sm:$0xf]  ;;  %v4152_v35 = vld [vmem:[#allocation5 + $0x110] sm:$0xf0] }
  0xe7   :  { %1745 = vmatpush.bf16.msra.mxu0 %v3539_v46  ;;  %v4199_v42 = vor.u32 %v4930_v39, %v4198_v38  ;;  %v4390_v46 = vld [vmem:[#allocation5 + $0x2e0] sm:$0xf]  ;;  %v4904_v39 = vld [vmem:[#allocation5 + $0xa4] sm:$0xf] }
  0xe8   :  { %1758 = vmatpush.bf16.msra.mxu1 %v3667_v49  ;;  %v4926_v49 = vld [vmem:[#allocation5 + $0x14c] sm:$0xf0] }
  0xe9   :  { %1771 = vmatpush.bf16.msra.mxu2 %v3795_v50  ;;  %v4183_v25 = vor.u32 %v4926_v49, %v4182_v48  ;;  %v4900_v49 = vld [vmem:[#allocation5 + $0x84] sm:$0xf] }
  0xea   :  { %1784 = vmatpush.bf16.msra.mxu3 %v3923_v55 }
  0xeb   :  { %1746 = vmatpush.bf16.msra.mxu0 %v3523_v62  ;;  %v1540_v32 = vpop.f32.mrf.mxu0  ;;  %v4375_v62 = vor.u32 %v4974_v9, %v4374_v8 }
  0xec   :  { %1759 = vmatpush.bf16.msra.mxu1 %v3651_v1  ;;  %v4022_v1 = vld [vmem:[#allocation5] sm:$0xf]  ;;  %v1541_v19 = vadd.f32 %v1540_v32, %v1528_v63  ;;  %v4928_v63 = vld [vmem:[#allocation5 + $0x164] sm:$0xf] }
  0xed   :  { %1772 = vmatpush.bf16.msra.mxu2 %v3779_v2  ;;  %v4886_v2 = vld [vmem:[#allocation5 + $0xc] sm:$0xf0] }
  0xee   :  { %1785 = vmatpush.bf16.msra.mxu3 %v3907_v3  ;;  %1747 = vmatmul.bf16.vlgmr.msra.gmra.mxu0 %v5193_v15  ;;  %v4214_v15 = vld [vmem:[#allocation5 + $0x180] sm:$0xf]  ;;  %v4023_v20 = vor.u32 %v4886_v2, %v4022_v1  ;;  %v4892_v2 = vld [vmem:[#allocation5 + $0x44] sm:$0xf] }
  0xef   :  { %2577 = vmatpush.bf16.msrb.mxu0 %v4135_v4  ;;  %1760 = vmatmul.bf16.vlgmr.msra.gmra.mxu1 %v5215_v36  ;;  %v1476_v36 = vadd.f32 %v5241_v47, %v1463_v26  ;;  %v4978_v47 = vld [vmem:[#allocation5 + $0x2ec] sm:$0xf0]  ;;  %v4150_v4 = vld [vmem:[#allocation5 + $0x100] sm:$0xf] }
  0xf0   :  { %2590 = vmatpush.bf16.msrb.mxu1 %v4263_v6  ;;  %1773 = vmatmul.bf16.vlgmr.msra.gmra.mxu2 %v5217_v37  ;;  %v4215_v37 = vor.u32 %v4934_v29, %v4214_v15  ;;  %v4391_v51 = vor.u32 %v4978_v47, %v4390_v46  ;;  %v4358_v6 = vld [vmem:[#allocation5 + $0x2a0] sm:$0xf]  ;;  %v4966_v26 = vld [vmem:[#allocation5 + $0x28c] sm:$0xf0]  ;;  %v4940_v29 = vld [vmem:[#allocation5 + $0x1c4] sm:$0xf] }
  0xf1   :  { %1786 = vmatmul.bf16.vlgmr.msra.gmra.mxu3 %v5213_v33  ;;  %v5269_v33 = vpop.f32.mrf.mxu1  ;;  %v1489_v41 = vadd.f32 %v5247_v58, %v1476_v36  ;;  %v4359_v16 = vor.u32 %v4970_v7, %v4358_v6  ;;  %v4310_v46 = vld [vmem:[#allocation5 + $0x240] sm:$0xf]  ;;  %v4958_v47 = vld [vmem:[#allocation5 + $0x24c] sm:$0xf0] }
  0xf2   :  { %2603 = vmatpush.bf16.msrb.mxu2 %v4391_v51  ;;  %v1554_v36 = vadd.f32 %v5269_v33, %v1541_v19  ;;  %v4088_v51 = vld [vmem:[#allocation5 + $0x90] sm:$0xf0]  ;;  %v4311_v52 = vor.u32 %v4958_v47, %v4310_v46  ;;  %v4270_v46 = vld [vmem:[#allocation5 + $0x1e8] sm:$0xf]  ;;  %v4947_v47 = vld [vmem:[#allocation5 + $0x1f4] sm:$0xf0] }
  0xf3   :  { %2578 = vmatpush.bf16.msrb.mxu0 %v4119_v13  ;;  %v5272_v45 = vpop.f32.mrf.mxu2  ;;  %v1542_v55 = vpop.f32.mrf.mxu0  ;;  %v1502_v58 = vadd.f32 %v5249_v59, %v1489_v41  ;;  %v4167_v59 = vor.u32 %v4922_v61, %v4166_v60  ;;  %v4936_v41 = vld [vmem:[#allocation5 + $0x1a4] sm:$0xf]  ;;  %v4072_v61 = vld [vmem:[#allocation5 + $0x70] sm:$0xf0] }
  0xf4   :  { %2591 = vmatpush.bf16.msrb.mxu1 %v4247_v18  ;;  %v5274_v50 = vpop.f32.mrf.mxu3  ;;  %v4944_v18 = vld [vmem:[#allocation5 + $0x1e4] sm:$0xf]  ;;  %v1567_v33 = vadd.f32 %v5272_v45, %v1554_v36  ;;  %v4954_v45 = vld [vmem:[#allocation5 + $0x22c] sm:$0xf0] }
  0xf5   :  { %v1515_v3 = vadd.f32 %v5251_v14, %v1502_v58  ;;  %v4151_v14 = vor.u32 %v4918_v10, %v4150_v4  ;;  %v4896_v60 = vld [vmem:[#allocation5 + $0x64] sm:$0xf]  ;;  %v4950_v4 = vld [vmem:[#allocation5 + $0x20c] sm:$0xf0] }
  0xf6   :  { %2604 = vmatpush.bf16.msrb.mxu2 %v4375_v62  ;;  %v1580_v55 = vadd.f32 %v5274_v50, %v1567_v33  ;;  %v4295_v62 = vor.u32 %v4954_v45, %v4294_v56  ;;  %v4075_v50 = vor.u32 %v4896_v60, %v4072_v61  ;;  %v4976_v10 = vld [vmem:[#allocation5 + $0x2e4] sm:$0xf]  ;;  %v4271_v56 = vor.u32 %v4947_v47, %v4270_v46  ;;  %v4911_v45 = vld [vmem:[#allocation5 + $0xd4] sm:$0xf0]  ;;  %v4254_v60 = vld [vmem:[#allocation5 + $0x1c8] sm:$0xf] }
  0xf7   :  { %2579 = vmatpush.bf16.msrb.mxu0 %v4103_v22  ;;  %v1791_v17 = vmax.f32 %v1515_v3, 0.0  ;;  %v4342_v22 = vld [vmem:[#allocation5 + $0x280] sm:$0xf]  ;;  %v4056_v3 = vld [vmem:[#allocation5 + $0x50] sm:$0xf0] }
  0xf8   :  { %2592 = vmatpush.bf16.msrb.mxu1 %v4231_v31  ;;  %v4267_v31 = vor.u32 %v4944_v18, %v4264_v23  ;;  %v4343_v15 = vor.u32 %v4966_v26, %v4342_v22  ;;  %v4059_v19 = vor.u32 %v4892_v2, %v4056_v3  ;;  %v4040_v22 = vld [vmem:[#allocation5 + $0x30] sm:$0xf0]  ;;  %v4943_v61 = vld [vmem:[#allocation5 + $0x1d4] sm:$0xf0]  ;;  %v5002_v2 = vld [vmem:[#allocation5 + $0x3ac] sm:$0xf0] }
  0xf9   :  { %v1555_v57 = vpop.f32.mrf.mxu1  ;;  %v5281_v32 = vpack.c.bf16 %v1791_v17, %v1791_v17  ;;  %v4907_v3 = vld [vmem:[#allocation5 + $0xb4] sm:$0xf0]  ;;  %v4438_v46 = vld [vmem:[#allocation5 + $0x340] sm:$0xf]  ;;  %v4990_v47 = vld [vmem:[#allocation5 + $0x34c] sm:$0xf0] }
  0xfa   :  { %2605 = vmatpush.bf16.msrb.mxu2 %v4359_v16  ;;  %v4395_v16 = vor.u32 %v4976_v10, %v4392_v11 }
  0xfb   :  { %2580 = vmatpush.bf16.msrb.mxu0 %v4087_v30  ;;  %v1568_v5 = vpop.f32.mrf.mxu2  ;;  %v4248_v30 = vld [vmem:[#allocation5 + $0x1d0] sm:$0xf0] }
  0xfc   :  { %2593 = vmatpush.bf16.msrb.mxu1 %v4215_v37  ;;  %v1581_v13 = vpop.f32.mrf.mxu3  ;;  %v4123_v37 = vor.u32 %v4908_v27, %v4120_v28  ;;  %v4251_v38 = vor.u32 %v4940_v29, %v4248_v30  ;;  %v4376_v27 = vld [vmem:[#allocation5 + $0x2d0] sm:$0xf0]  ;;  %v4920_v28 = vld [vmem:[#allocation5 + $0x124] sm:$0xf] }
  0xfd   :  { %v4184_v13 = vld [vmem:[#allocation5 + $0x150] sm:$0xf0]  ;;  %v4884_v30 = vld [vmem:[#allocation5 + $0x4] sm:$0xf] }
  0xfe   :  { %2606 = vmatpush.bf16.msrb.mxu2 %v4343_v15  ;;  %v4168_v15 = vld [vmem:[#allocation5 + $0x130] sm:$0xf0] }
  0xff   :  { %2581 = vmatpush.bf16.msrb.mxu0 %v4071_v44  ;;  %v4104_v44 = vld [vmem:[#allocation5 + $0xb0] sm:$0xf0] }
 0x100   :  { %2594 = vmatpush.bf16.msrb.mxu1 %v4199_v42  ;;  %v4232_v42 = vld [vmem:[#allocation5 + $0x1b0] sm:$0xf0]  ;;  %v4107_v43 = vor.u32 %v4904_v39, %v4104_v44  ;;  %v4518_v39 = vld [vmem:[#allocation5 + $0x3e0] sm:$0xf]  ;;  %v5010_v44 = vld [vmem:[#allocation5 + $0x3ec] sm:$0xf0] }
 0x101   :  { %v4235_v48 = vor.u32 %v4936_v41, %v4232_v42  ;;  %v4142_v41 = vld [vmem:[#allocation5 + $0xe8] sm:$0xf]  ;;  %v4915_v42 = vld [vmem:[#allocation5 + $0xf4] sm:$0xf0]  ;;  %v4519_v33 = vor.u32 %v5010_v44, %v4518_v39 }
 0x102   :  { %2607 = vmatpush.bf16.msrb.mxu2 %v4327_v40  ;;  %v4968_v40 = vld [vmem:[#allocation5 + $0x2a4] sm:$0xf]  ;;  %v4206_v39 = vld [vmem:[#allocation5 + $0x168] sm:$0xf]  ;;  %v4931_v44 = vld [vmem:[#allocation5 + $0x174] sm:$0xf0] }
 0x103   :  { %2582 = vmatpush.bf16.msrb.mxu0 %v4055_v53  ;;  %v4932_v53 = vld [vmem:[#allocation5 + $0x184] sm:$0xf]  ;;  %2616 = vmatpush.bf16.msrb.mxu3 %v4519_v33 }
 0x104   :  { %2595 = vmatpush.bf16.msrb.mxu1 %v4183_v25  ;;  %v4091_v25 = vor.u32 %v4900_v49, %v4088_v51  ;;  %v4219_v8 = vor.u32 %v4932_v53, %v4216_v54  ;;  %v4155_v53 = vor.u32 %v4916_v34, %v4152_v35  ;;  %v4143_v54 = vor.u32 %v4915_v42, %v4142_v41  ;;  %v4952_v35 = vld [vmem:[#allocation5 + $0x224] sm:$0xf] }
 0x106   :  { %2608 = vmatpush.bf16.msrb.mxu2 %v4311_v52 }
 0x107   :  { %2583 = vmatpush.bf16.msrb.mxu0 %v4039_v0  ;;  %v4200_v0 = vld [vmem:[#allocation5 + $0x170] sm:$0xf0] }
 0x108   :  { %2596 = vmatpush.bf16.msrb.mxu1 %v4167_v59  ;;  %v4278_v59 = vld [vmem:[#allocation5 + $0x200] sm:$0xf]  ;;  %v4203_v6 = vor.u32 %v4928_v63, %v4200_v0  ;;  %v4110_v0 = vld [vmem:[#allocation5 + $0xa8] sm:$0xf] }
 0x109   :  { %v4279_v7 = vor.u32 %v4950_v4, %v4278_v59  ;;  %v4960_v4 = vld [vmem:[#allocation5 + $0x264] sm:$0xf]  ;;  %v4111_v11 = vor.u32 %v4907_v3, %v4110_v0  ;;  %v4923_v0 = vld [vmem:[#allocation5 + $0x134] sm:$0xf0] }
 0x10a   :  { %2609 = vmatpush.bf16.msrb.mxu2 %v4295_v62 }
 0x10b   :  { %2584 = vmatpush.bf16.msrb.mxu0 %v4023_v20  ;;  %v1592_v58 = vpop.f32.mrf.mxu0  ;;  %v4888_v20 = vld [vmem:[#allocation5 + $0x24] sm:$0xf] }
 0x10c   :  { %2597 = vmatpush.bf16.msrb.mxu1 %v4151_v14  ;;  %v1593_v57 = vadd.f32 %v1592_v58, %v1580_v55  ;;  %v1605_v9 = vpop.f32.mrf.mxu1  ;;  %v4043_v36 = vor.u32 %v4888_v20, %v4040_v22  ;;  %v4126_v55 = vld [vmem:[#allocation5 + $0xc8] sm:$0xf]  ;;  %v4502_v58 = vld [vmem:[#allocation5 + $0x3c0] sm:$0xf]  ;;  %v4312_v22 = vld [vmem:[#allocation5 + $0x250] sm:$0xf0] }
 0x10d   :  { %v4127_v63 = vor.u32 %v4911_v45, %v4126_v55  ;;  %v4094_v20 = vld [vmem:[#allocation5 + $0x88] sm:$0xf] }
 0x10e   :  { %2585 = vmatmul.bf16.vlgmr.msrb.gmra.mxu0 %v5281_v32  ;;  %v1606_v1 = vadd.f32 %v1605_v9, %v1593_v57  ;;  %2610 = vmatpush.bf16.msrb.mxu2 %v4279_v7  ;;  %v4344_v9 = vld [vmem:[#allocation5 + $0x290] sm:$0xf0]  ;;  %v4939_v7 = vld [vmem:[#allocation5 + $0x1b4] sm:$0xf0]  ;;  %v4190_v55 = vld [vmem:[#allocation5 + $0x148] sm:$0xf] }
 0x10f   :  { %2629 = vmatpush.bf16.msra.mxu0 %v4139_v21  ;;  %v4187_v21 = vor.u32 %v4924_v12, %v4184_v13  ;;  %v4470_v12 = vld [vmem:[#allocation5 + $0x380] sm:$0xf]  ;;  %v4998_v13 = vld [vmem:[#allocation5 + $0x38c] sm:$0xf0] }
 0x110   :  { %2642 = vmatpush.bf16.msra.mxu1 %v4267_v31  ;;  %v1792_v5 = vmax.f32 %v1606_v1, 0.0  ;;  %v4972_v31 = vld [vmem:[#allocation5 + $0x2c4] sm:$0xf]  ;;  %v4486_v1 = vld [vmem:[#allocation5 + $0x3a0] sm:$0xf] }
 0x111   :  { %v4379_v29 = vor.u32 %v4972_v31, %v4376_v27  ;;  %v4487_v59 = vor.u32 %v5002_v2, %v4486_v1  ;;  %v4935_v31 = vld [vmem:[#allocation5 + $0x194] sm:$0xf0] }
 0x112   :  { %v5286_v18 = vpack.c.bf16 %v1792_v5, %v1792_v5  ;;  %2655 = vmatpush.bf16.msra.mxu2 %v4395_v16  ;;  %v4328_v5 = vld [vmem:[#allocation5 + $0x270] sm:$0xf0]  ;;  %v4956_v16 = vld [vmem:[#allocation5 + $0x244] sm:$0xf] }
 0x113   :  { %2630 = vmatpush.bf16.msra.mxu0 %v4123_v37  ;;  %v5288_v23 = vpop.f32.mrf.mxu2  ;;  %v1594_v14 = vpop.f32.mrf.mxu0  ;;  %v4024_v37 = vld [vmem:[#allocation5 + $0x10] sm:$0xf0]  ;;  %v4331_v10 = vor.u32 %v4960_v4, %v4328_v5  ;;  %v4315_v27 = vor.u32 %v4956_v16, %v4312_v22  ;;  %v4887_v4 = vld [vmem:[#allocation5 + $0x14] sm:$0xf0]  ;;  %v4406_v5 = vld [vmem:[#allocation5 + $0x300] sm:$0xf] }
 0x114   :  { %2643 = vmatpush.bf16.msra.mxu1 %v4251_v38  ;;  %v5290_v17 = vpop.f32.mrf.mxu3  ;;  %v1607_v26 = vpop.f32.mrf.mxu1  ;;  %v4171_v38 = vor.u32 %v4920_v28, %v4168_v15  ;;  %v4027_v51 = vor.u32 %v4884_v30, %v4024_v37  ;;  %v4903_v14 = vld [vmem:[#allocation5 + $0x94] sm:$0xf0]  ;;  %v4078_v15 = vld [vmem:[#allocation5 + $0x68] sm:$0xf]  ;;  %v4994_v30 = vld [vmem:[#allocation5 + $0x36c] sm:$0xf0] }
 0x115   :  { %2598 = vmatmul.bf16.vlgmr.msrb.gmra.mxu1 %v5286_v18  ;;  %v4222_v26 = vld [vmem:[#allocation5 + $0x188] sm:$0xf]  ;;  %v4095_v28 = vor.u32 %v4903_v14, %v4094_v20  ;;  %v4899_v37 = vld [vmem:[#allocation5 + $0x74] sm:$0xf0]  ;;  %v4144_v20 = vld [vmem:[#allocation5 + $0xf8] sm:$0xf0] }
 0x116   :  { %2656 = vmatpush.bf16.msra.mxu2 %v4379_v29  ;;  %v4454_v29 = vld [vmem:[#allocation5 + $0x360] sm:$0xf]  ;;  %v4079_v33 = vor.u32 %v4899_v37, %v4078_v15  ;;  %v4919_v16 = vld [vmem:[#allocation5 + $0x114] sm:$0xf0]  ;;  %v4272_v22 = vld [vmem:[#allocation5 + $0x1f8] sm:$0xf0] }
 0x117   :  { %2631 = vmatpush.bf16.msra.mxu0 %v4107_v43  ;;  %v4360_v43 = vld [vmem:[#allocation5 + $0x2b0] sm:$0xf0]  ;;  %v4455_v34 = vor.u32 %v4994_v30, %v4454_v29  ;;  %v5004_v29 = vld [vmem:[#allocation5 + $0x3c4] sm:$0xf]  ;;  %v4909_v37 = vld [vmem:[#allocation5 + $0xcc] sm:$0xf] }
 0x118   :  { %2644 = vmatpush.bf16.msra.mxu1 %v4235_v48  ;;  %v4363_v49 = vor.u32 %v4968_v40, %v4360_v43  ;;  %v4062_v43 = vld [vmem:[#allocation5 + $0x48] sm:$0xf]  ;;  %v4504_v30 = vld [vmem:[#allocation5 + $0x3d0] sm:$0xf0] }
 0x11a   :  { %2657 = vmatpush.bf16.msra.mxu2 %v4363_v49  ;;  %v4895_v49 = vld [vmem:[#allocation5 + $0x54] sm:$0xf0] }
 0x11b   :  { %2632 = vmatpush.bf16.msra.mxu0 %v4091_v25  ;;  %v1620_v48 = vpop.f32.mrf.mxu2  ;;  %v5006_v25 = vld [vmem:[#allocation5 + $0x3cc] sm:$0xf0]  ;;  %v4063_v45 = vor.u32 %v4895_v49, %v4062_v43  ;;  %v4937_v49 = vld [vmem:[#allocation5 + $0x1ac] sm:$0xf] }
 0x11c   :  { %2645 = vmatpush.bf16.msra.mxu1 %v4219_v8  ;;  %v1633_v52 = vpop.f32.mrf.mxu3  ;;  %v4503_v57 = vor.u32 %v5006_v25, %v4502_v58  ;;  %v4964_v8 = vld [vmem:[#allocation5 + $0x284] sm:$0xf]  ;;  %v4207_v48 = vor.u32 %v4931_v44, %v4206_v39  ;;  %v4927_v58 = vld [vmem:[#allocation5 + $0x154] sm:$0xf0]  ;;  %v4256_v39 = vld [vmem:[#allocation5 + $0x1d8] sm:$0xf0] }
 0x11d   :  { %v4347_v62 = vor.u32 %v4964_v8, %v4344_v9  ;;  %v4948_v52 = vld [vmem:[#allocation5 + $0x204] sm:$0xf]  ;;  %v4422_v8 = vld [vmem:[#allocation5 + $0x320] sm:$0xf]  ;;  %v4191_v9 = vor.u32 %v4927_v58, %v4190_v55  ;;  %v4901_v58 = vld [vmem:[#allocation5 + $0x8c] sm:$0xf] }
 0x11e   :  { %2617 = vmatpush.bf16.msrb.mxu3 %v4503_v57 }
 0x11f   :  { %2633 = vmatpush.bf16.msra.mxu0 %v4075_v50  ;;  %v4255_v50 = vor.u32 %v4943_v61, %v4254_v60  ;;  %2658 = vmatpush.bf16.msra.mxu2 %v4347_v62  ;;  %v4046_v60 = vld [vmem:[#allocation5 + $0x28] sm:$0xf]  ;;  %v4891_v61 = vld [vmem:[#allocation5 + $0x34] sm:$0xf0]  ;;  %v4986_v62 = vld [vmem:[#allocation5 + $0x32c] sm:$0xf0] }
 0x120   :  { %2646 = vmatpush.bf16.msra.mxu1 %v4203_v6  ;;  %v4238_v6 = vld [vmem:[#allocation5 + $0x1a8] sm:$0xf]  ;;  %v4423_v2 = vor.u32 %v4986_v62, %v4422_v8  ;;  %v4933_v8 = vld [vmem:[#allocation5 + $0x18c] sm:$0xf]  ;;  %v4456_v62 = vld [vmem:[#allocation5 + $0x370] sm:$0xf0] }
 0x122   :  { %2618 = vmatpush.bf16.msrb.mxu3 %v4487_v59  ;;  %v4047_v59 = vor.u32 %v4891_v61, %v4046_v60  ;;  %v4992_v61 = vld [vmem:[#allocation5 + $0x364] sm:$0xf] }
 0x123   :  { %2634 = vmatpush.bf16.msra.mxu0 %v4059_v19  ;;  %v4239_v19 = vor.u32 %v4939_v7, %v4238_v6  ;;  %2659 = vmatpush.bf16.msra.mxu2 %v4331_v10  ;;  %v4982_v6 = vld [vmem:[#allocation5 + $0x30c] sm:$0xf0]  ;;  %v4158_v10 = vld [vmem:[#allocation5 + $0x108] sm:$0xf] }
 0x124   :  { %2647 = vmatpush.bf16.msra.mxu1 %v4187_v21  ;;  %v4471_v21 = vor.u32 %v4998_v13, %v4470_v12  ;;  %v5008_v12 = vld [vmem:[#allocation5 + $0x3e4] sm:$0xf]  ;;  %v4520_v13 = vld [vmem:[#allocation5 + $0x3f0] sm:$0xf0] }
 0x125   :  { %v4523_v14 = vor.u32 %v5008_v12, %v4520_v13  ;;  %v4893_v13 = vld [vmem:[#allocation5 + $0x4c] sm:$0xf] }
 0x126   :  { %2619 = vmatpush.bf16.msrb.mxu3 %v4471_v21  ;;  %v4945_v21 = vld [vmem:[#allocation5 + $0x1ec] sm:$0xf] }
 0x127   :  { %2635 = vmatpush.bf16.msra.mxu0 %v4043_v36  ;;  %v4223_v36 = vor.u32 %v4935_v31, %v4222_v26  ;;  %2660 = vmatpush.bf16.msra.mxu2 %v4315_v27 }
 0x128   :  { %2648 = vmatpush.bf16.msra.mxu1 %v4171_v38  ;;  %v4296_v38 = vld [vmem:[#allocation5 + $0x230] sm:$0xf0] }
 0x129   :  { %v4299_v41 = vor.u32 %v4952_v35, %v4296_v38  ;;  %v4507_v35 = vor.u32 %v5004_v29, %v4504_v30  ;;  %v4941_v38 = vld [vmem:[#allocation5 + $0x1cc] sm:$0xf] }
 0x12a   :  { %2620 = vmatpush.bf16.msrb.mxu3 %v4455_v34  ;;  %v4128_v34 = vld [vmem:[#allocation5 + $0xd8] sm:$0xf0] }
 0x12b   :  { %2636 = vmatpush.bf16.msra.mxu0 %v4027_v51  ;;  %v5295_v40 = vpop.f32.mrf.mxu0  ;;  %2661 = vmatpush.bf16.msra.mxu2 %v4299_v41  ;;  %v4439_v51 = vor.u32 %v4990_v47, %v4438_v46  ;;  %v4131_v44 = vor.u32 %v4909_v37, %v4128_v34  ;;  %v5000_v41 = vld [vmem:[#allocation5 + $0x3a4] sm:$0xf]  ;;  %v4259_v46 = vor.u32 %v4941_v38, %v4256_v39  ;;  %v4905_v47 = vld [vmem:[#allocation5 + $0xac] sm:$0xf] }
 0x12c   :  { %2649 = vmatpush.bf16.msra.mxu1 %v4155_v53  ;;  %v5297_v42 = vpop.f32.mrf.mxu1  ;;  %v4280_v53 = vld [vmem:[#allocation5 + $0x210] sm:$0xf0]  ;;  %v4921_v34 = vld [vmem:[#allocation5 + $0x12c] sm:$0xf] }
 0x12d   :  { %v4283_v25 = vor.u32 %v4948_v52, %v4280_v53  ;;  %v4996_v52 = vld [vmem:[#allocation5 + $0x384] sm:$0xf]  ;;  %v4472_v53 = vld [vmem:[#allocation5 + $0x390] sm:$0xf0] }
 0x12e   :  { %2637 = vmatmul.bf16.vlgmr.msra.gmra.mxu0 %v5281_v32  ;;  %2621 = vmatpush.bf16.msrb.mxu3 %v4439_v51  ;;  %v4240_v51 = vld [vmem:[#allocation5 + $0x1b8] sm:$0xf0] }
 0x12f   :  { %2681 = vmatpush.bf16.msrb.mxu0 %v4143_v54  ;;  %2650 = vmatmul.bf16.vlgmr.msra.gmra.mxu1 %v5286_v18  ;;  %v301_v54 = vperm.slane %v5258_v24, 2  ;;  %v4174_v24 = vld [vmem:[#allocation5 + $0x128] sm:$0xf] }
 0x130   :  { %2694 = vmatpush.bf16.msrb.mxu1 %v4271_v56  ;;  %2662 = vmatpush.bf16.msra.mxu2 %v4283_v25  ;;  %v4175_v7 = vor.u32 %v4923_v0, %v4174_v24  ;;  %v4096_v25 = vld [vmem:[#allocation5 + $0x98] sm:$0xf0]  ;;  %v4897_v0 = vld [vmem:[#allocation5 + $0x6c] sm:$0xf] }
 0x131   :  { %v4099_v60 = vor.u32 %v4901_v58, %v4096_v25 }
 0x132   :  { %2622 = vmatpush.bf16.msrb.mxu3 %v4423_v2 }
 0x133   :  { %2682 = vmatpush.bf16.msrb.mxu0 %v4127_v63  ;;  %v5300_v56 = vpop.f32.mrf.mxu2  ;;  %v1619_v63 = vadd.f32 %v5288_v23, %v301_v54  ;;  %v1646_v1 = vpop.f32.mrf.mxu0 }
 0x134   :  { %2695 = vmatpush.bf16.msrb.mxu1 %v4255_v50  ;;  %v5302_v57 = vpop.f32.mrf.mxu3  ;;  %v4030_v50 = vld [vmem:[#allocation5 + $0x8] sm:$0xf]  ;;  %v1659_v3 = vpop.f32.mrf.mxu1  ;;  %v4080_v1 = vld [vmem:[#allocation5 + $0x78] sm:$0xf0] }
 0x135   :  { %v1632_v23 = vadd.f32 %v5290_v17, %v1619_v63  ;;  %v4031_v31 = vor.u32 %v4887_v4, %v4030_v50  ;;  %v4275_v17 = vor.u32 %v4945_v21, %v4272_v22  ;;  %v4929_v50 = vld [vmem:[#allocation5 + $0x16c] sm:$0xf]  ;;  %v4208_v3 = vld [vmem:[#allocation5 + $0x178] sm:$0xf0]  ;;  %v4398_v4 = vld [vmem:[#allocation5 + $0x2e8] sm:$0xf] }
 0x136   :  { %v4382_v22 = vld [vmem:[#allocation5 + $0x2c8] sm:$0xf] }
 0x137   :  { %2683 = vmatpush.bf16.msrb.mxu0 %v4111_v11  ;;  %v4407_v11 = vor.u32 %v4982_v6, %v4406_v5  ;;  %v4979_v5 = vld [vmem:[#allocation5 + $0x2f4] sm:$0xf0]  ;;  %v4083_v6 = vor.u32 %v4897_v0, %v4080_v1  ;;  %v4318_v1 = vld [vmem:[#allocation5 + $0x248] sm:$0xf] }
 0x138   :  { %2696 = vmatpush.bf16.msrb.mxu1 %v4239_v19  ;;  %v4913_v19 = vld [vmem:[#allocation5 + $0xec] sm:$0xf] }
 0x139   :  { %2623 = vmatpush.bf16.msrb.mxu3 %v4407_v11  ;;  %v4147_v15 = vor.u32 %v4913_v19, %v4144_v20  ;;  %v4440_v11 = vld [vmem:[#allocation5 + $0x350] sm:$0xf0]  ;;  %v4925_v19 = vld [vmem:[#allocation5 + $0x14c] sm:$0xf]  ;;  %v4192_v20 = vld [vmem:[#allocation5 + $0x158] sm:$0xf0] }
 0x13b   :  { %2684 = vmatpush.bf16.msrb.mxu0 %v4095_v28  ;;  %v1672_v26 = vpop.f32.mrf.mxu2  ;;  %v4159_v28 = vor.u32 %v4919_v16, %v4158_v10  ;;  %v4988_v10 = vld [vmem:[#allocation5 + $0x344] sm:$0xf]  ;;  %v4399_v16 = vor.u32 %v4979_v5, %v4398_v4 }
 0x13c   :  { %2697 = vmatpush.bf16.msrb.mxu1 %v4223_v36  ;;  %v1685_v27 = vpop.f32.mrf.mxu3  ;;  %v1645_v36 = vadd.f32 %v5295_v40, %v1632_v23  ;;  %v4064_v23 = vld [vmem:[#allocation5 + $0x58] sm:$0xf0]  ;;  %v4975_v26 = vld [vmem:[#allocation5 + $0x2d4] sm:$0xf0] }
 0x13d   :  { %2668 = vmatpush.bf16.msra.mxu3 %v4523_v14  ;;  %v4443_v14 = vor.u32 %v4988_v10, %v4440_v11  ;;  %v4984_v27 = vld [vmem:[#allocation5 + $0x324] sm:$0xf]  ;;  %v4383_v37 = vor.u32 %v4975_v26, %v4382_v22  ;;  %v4286_v10 = vld [vmem:[#allocation5 + $0x208] sm:$0xf]  ;;  %v4951_v11 = vld [vmem:[#allocation5 + $0x214] sm:$0xf0] }
 0x13e   :  { %v1658_v43 = vadd.f32 %v5297_v42, %v1645_v36  ;;  %v4243_v42 = vor.u32 %v4937_v49, %v4240_v51  ;;  %v4889_v36 = vld [vmem:[#allocation5 + $0x2c] sm:$0xf] }
 0x13f   :  { %2685 = vmatpush.bf16.msrb.mxu0 %v4079_v33  ;;  %v4488_v33 = vld [vmem:[#allocation5 + $0x3b0] sm:$0xf0]  ;;  %v4885_v49 = vld [vmem:[#allocation5 + $0xc] sm:$0xf] }
 0x140   :  { %2698 = vmatpush.bf16.msrb.mxu1 %v4207_v48  ;;  %v4112_v48 = vld [vmem:[#allocation5 + $0xb8] sm:$0xf0]  ;;  %v4491_v40 = vor.u32 %v5000_v41, %v4488_v33  ;;  %v1671_v55 = vadd.f32 %v5300_v56, %v1658_v43  ;;  %v4459_v56 = vor.u32 %v4992_v61, %v4456_v62  ;;  %v4971_v41 = vld [vmem:[#allocation5 + $0x2b4] sm:$0xf0]  ;;  %v4334_v62 = vld [vmem:[#allocation5 + $0x268] sm:$0xf] }
 0x141   :  { %2669 = vmatpush.bf16.msra.mxu3 %v4507_v35  ;;  %v4115_v54 = vor.u32 %v4905_v47, %v4112_v48  ;;  %v4176_v35 = vld [vmem:[#allocation5 + $0x138] sm:$0xf0]  ;;  %v4408_v47 = vld [vmem:[#allocation5 + $0x310] sm:$0xf0] }
 0x142   :  { %v1684_v63 = vadd.f32 %v5302_v57, %v1671_v55  ;;  %v4211_v57 = vor.u32 %v4929_v50, %v4208_v3  ;;  %v4179_v48 = vor.u32 %v4921_v34, %v4176_v35  ;;  %v4350_v55 = vld [vmem:[#allocation5 + $0x288] sm:$0xf]  ;;  %v4965_v35 = vld [vmem:[#allocation5 + $0x28c] sm:$0xf] }
 0x143   :  { %2686 = vmatpush.bf16.msrb.mxu0 %v4063_v45  ;;  %v4475_v45 = vor.u32 %v4996_v52, %v4472_v53  ;;  %v4917_v52 = vld [vmem:[#allocation5 + $0x10c] sm:$0xf]  ;;  %v4160_v53 = vld [vmem:[#allocation5 + $0x118] sm:$0xf0]  ;;  %v4302_v3 = vld [vmem:[#allocation5 + $0x228] sm:$0xf] }
 0x144   :  { %2699 = vmatpush.bf16.msrb.mxu1 %v4191_v9  ;;  %v4224_v9 = vld [vmem:[#allocation5 + $0x198] sm:$0xf0]  ;;  %v4163_v25 = vor.u32 %v4917_v52, %v4160_v53 }
 0x145   :  { %2670 = vmatpush.bf16.msra.mxu3 %v4491_v40  ;;  %v4227_v24 = vor.u32 %v4933_v8, %v4224_v9  ;;  %v4032_v40 = vld [vmem:[#allocation5 + $0x18] sm:$0xf0] }
 0x146   :  { %v4035_v58 = vor.u32 %v4885_v49, %v4032_v40  ;;  %v4336_v49 = vld [vmem:[#allocation5 + $0x278] sm:$0xf0]  ;;  %v4494_v40 = vld [vmem:[#allocation5 + $0x3a8] sm:$0xf] }
 0x147   :  { %2687 = vmatpush.bf16.msrb.mxu0 %v4047_v59 }
 0x148   :  { %2700 = vmatpush.bf16.msrb.mxu1 %v4175_v7 }
 0x149   :  { %2671 = vmatpush.bf16.msra.mxu3 %v4475_v45 }
 0x14b   :  { %2688 = vmatpush.bf16.msrb.mxu0 %v4031_v31  ;;  %v1696_v2 = vpop.f32.mrf.mxu0  ;;  %v4067_v31 = vor.u32 %v4893_v13, %v4064_v23  ;;  %v4287_v13 = vor.u32 %v4951_v11, %v4286_v10  ;;  %v4973_v23 = vld [vmem:[#allocation5 + $0x2cc] sm:$0xf]  ;;  %v4414_v11 = vld [vmem:[#allocation5 + $0x308] sm:$0xf] }
 0x14c   :  { %2701 = vmatpush.bf16.msrb.mxu1 %v4159_v28  ;;  %v1697_v59 = vadd.f32 %v1696_v2, %v1684_v63  ;;  %v5312_v7 = vpop.f32.mrf.mxu1  ;;  %v4424_v28 = vld [vmem:[#allocation5 + $0x330] sm:$0xf0]  ;;  %v4963_v63 = vld [vmem:[#allocation5 + $0x274] sm:$0xf0] }
 0x14d   :  { %2672 = vmatpush.bf16.msra.mxu3 %v4459_v56  ;;  %v4427_v39 = vor.u32 %v4984_v27, %v4424_v28  ;;  %v4959_v56 = vld [vmem:[#allocation5 + $0x254] sm:$0xf0]  ;;  %v4969_v28 = vld [vmem:[#allocation5 + $0x2ac] sm:$0xf] }
 0x14e   :  { %2689 = vmatmul.bf16.vlgmr.msrb.gmra.mxu0 %v5281_v32  ;;  %v1793_v12 = vmax.f32 %v1697_v59, 0.0  ;;  %v4319_v2 = vor.u32 %v4959_v56, %v4318_v1  ;;  %v4955_v59 = vld [vmem:[#allocation5 + $0x234] sm:$0xf0]  ;;  %v4446_v56 = vld [vmem:[#allocation5 + $0x348] sm:$0xf] }
 0x14f   :  { %2733 = vmatpush.bf16.msra.mxu0 %v4147_v15  ;;  %2702 = vmatmul.bf16.vlgmr.msrb.gmra.mxu1 %v5286_v18  ;;  %v4195_v15 = vor.u32 %v4925_v19, %v4192_v20  ;;  %v4303_v4 = vor.u32 %v4955_v59, %v4302_v3  ;;  %v4430_v59 = vld [vmem:[#allocation5 + $0x328] sm:$0xf] }
 0x150   :  { %2746 = vmatpush.bf16.msra.mxu1 %v4275_v17  ;;  %v5314_v21 = vpack.c.bf16 %v1793_v12, %v1793_v12  ;;  %v4048_v17 = vld [vmem:[#allocation5 + $0x38] sm:$0xf0]  ;;  %v4977_v12 = vld [vmem:[#allocation5 + $0x2ec] sm:$0xf] }
 0x151   :  { %2673 = vmatpush.bf16.msra.mxu3 %v4443_v14  ;;  %v4051_v33 = vor.u32 %v4889_v36, %v4048_v17  ;;  %v5011_v36 = vld [vmem:[#allocation5 + $0x3f4] sm:$0xf0] }
 0x152   :  { %2611 = vmatmul.bf16.vlgmr.msrb.gmra.mxu2 %v5314_v21 }
 0x153   :  { %2734 = vmatpush.bf16.msra.mxu0 %v4131_v44  ;;  %v1722_v29 = vpop.f32.mrf.mxu2  ;;  %2707 = vmatpush.bf16.msrb.mxu2 %v4399_v16  ;;  %v1698_v38 = vpop.f32.mrf.mxu0  ;;  %v4366_v44 = vld [vmem:[#allocation5 + $0x2a8] sm:$0xf]  ;;  %v4384_v16 = vld [vmem:[#allocation5 + $0x2d8] sm:$0xf0] }
 0x154   :  { %2747 = vmatpush.bf16.msra.mxu1 %v4259_v46  ;;  %v1735_v30 = vpop.f32.mrf.mxu3  ;;  %v1711_v43 = vpop.f32.mrf.mxu1  ;;  %v4980_v46 = vld [vmem:[#allocation5 + $0x304] sm:$0xf]  ;;  %v4367_v51 = vor.u32 %v4971_v41, %v4366_v44  ;;  %v4352_v38 = vld [vmem:[#allocation5 + $0x298] sm:$0xf0]  ;;  %v4510_v44 = vld [vmem:[#allocation5 + $0x3c8] sm:$0xf] }
 0x155   :  { %2674 = vmatpush.bf16.msra.mxu3 %v4427_v39  ;;  %v5007_v41 = vld [vmem:[#allocation5 + $0x3d4] sm:$0xf0] }
 0x157   :  { %2735 = vmatpush.bf16.msra.mxu0 %v4115_v54  ;;  %2708 = vmatpush.bf16.msrb.mxu2 %v4383_v37  ;;  %v4411_v54 = vor.u32 %v4980_v46, %v4408_v47  ;;  %v4355_v46 = vor.u32 %v4965_v35, %v4352_v38  ;;  %v4511_v47 = vor.u32 %v5007_v41, %v4510_v44  ;;  %v4989_v35 = vld [vmem:[#allocation5 + $0x34c] sm:$0xf]  ;;  %v4448_v38 = vld [vmem:[#allocation5 + $0x358] sm:$0xf0] }
 0x158   :  { %2748 = vmatpush.bf16.msra.mxu1 %v4243_v42  ;;  %v4967_v42 = vld [vmem:[#allocation5 + $0x294] sm:$0xf0]  ;;  %v4451_v41 = vor.u32 %v4989_v35, %v4448_v38 }
 0x159   :  { %v4351_v9 = vor.u32 %v4967_v42, %v4350_v55  ;;  %2675 = vmatpush.bf16.msra.mxu3 %v4411_v54  ;;  %v4957_v54 = vld [vmem:[#allocation5 + $0x24c] sm:$0xf]  ;;  %v4320_v55 = vld [vmem:[#allocation5 + $0x258] sm:$0xf0]  ;;  %v4478_v42 = vld [vmem:[#allocation5 + $0x388] sm:$0xf] }
 0x15b   :  { %2736 = vmatpush.bf16.msra.mxu0 %v4099_v60  ;;  %v1724_v45 = vpop.f32.mrf.mxu2  ;;  %2709 = vmatpush.bf16.msrb.mxu2 %v4367_v51  ;;  %v5050_v60 = vld [vmem:[%s5457_s2] sm:$0xf]  ;;  %v5003_v51 = vld [vmem:[#allocation5 + $0x3b4] sm:$0xf0] }
 0x15c   :  { %2749 = vmatpush.bf16.msra.mxu1 %v4227_v24  ;;  %v1737_v8 = vpop.f32.mrf.mxu3  ;;  %v302_v61 = vperm.slane %v5050_v60, 3  ;;  %v4335_v24 = vor.u32 %v4963_v63, %v4334_v62  ;;  %v4495_v53 = vor.u32 %v5003_v51, %v4494_v40  ;;  %v4462_v60 = vld [vmem:[#allocation5 + $0x368] sm:$0xf]  ;;  %v4981_v40 = vld [vmem:[#allocation5 + $0x30c] sm:$0xf] }
 0x15d   :  { %v4953_v8 = vld [vmem:[#allocation5 + $0x22c] sm:$0xf]  ;;  %v4416_v51 = vld [vmem:[#allocation5 + $0x318] sm:$0xf0] }
 0x15e   :  { %v1710_v0 = vadd.f32 %v5312_v7, %v302_v61  ;;  %v4995_v61 = vld [vmem:[#allocation5 + $0x374] sm:$0xf0] }
 0x15f   :  { %2737 = vmatpush.bf16.msra.mxu0 %v4083_v6  ;;  %2710 = vmatpush.bf16.msrb.mxu2 %v4351_v9  ;;  %v4304_v9 = vld [vmem:[#allocation5 + $0x238] sm:$0xf0]  ;;  %v4463_v63 = vor.u32 %v4995_v61, %v4462_v60  ;;  %v5016_v61 = vld [vmem:[%s5460_s5 + $0x20] sm:$0xff] }
 0x160   :  { %2750 = vmatpush.bf16.msra.mxu1 %v4211_v57  ;;  %v1723_v50 = vadd.f32 %v1722_v29, %v1710_v0  ;;  %v4307_v62 = vor.u32 %v4953_v8, %v4304_v9  ;;  %v4288_v0 = vld [vmem:[#allocation5 + $0x218] sm:$0xf0]  ;;  %v5018_v8 = vld [vmem:[%s5460_s5 + $0x30] sm:$0xff] }
 0x162   :  { %2663 = vmatmul.bf16.vlgmr.msra.gmra.mxu2 %v5314_v21  ;;  %v1736_v5 = vadd.f32 %v1735_v30, %v1723_v50  ;;  %v4526_v30 = vld [vmem:[#allocation5 + $0x3e8] sm:$0xf] }
 0x163   :  { %2738 = vmatpush.bf16.msra.mxu0 %v4067_v31  ;;  %2711 = vmatpush.bf16.msrb.mxu2 %v4335_v24  ;;  %v4387_v31 = vor.u32 %v4973_v23, %v4384_v16  ;;  %v4527_v34 = vor.u32 %v5011_v36, %v4526_v30  ;;  %v4949_v24 = vld [vmem:[#allocation5 + $0x20c] sm:$0xf]  ;;  %v4512_v16 = vld [vmem:[#allocation5 + $0x3d8] sm:$0xf0] }
 0x164   :  { %2751 = vmatpush.bf16.msra.mxu1 %v4195_v15  ;;  %v4368_v15 = vld [vmem:[#allocation5 + $0x2b8] sm:$0xf0]  ;;  %v4291_v50 = vor.u32 %v4949_v24, %v4288_v0  ;;  %v5005_v23 = vld [vmem:[#allocation5 + $0x3cc] sm:$0xf]  ;;  %v5014_v0 = vld [vmem:[%s5460_s5 + $0x10] sm:$0xff] }
 0x165   :  { %v4371_v37 = vor.u32 %v4969_v28, %v4368_v15  ;;  %v4480_v28 = vld [vmem:[#allocation5 + $0x398] sm:$0xf0]  ;;  %v4993_v30 = vld [vmem:[#allocation5 + $0x36c] sm:$0xf] }
 0x166   :  { %v4464_v36 = vld [vmem:[#allocation5 + $0x378] sm:$0xf0] }
 0x167   :  { %2739 = vmatpush.bf16.msra.mxu0 %v4051_v33  ;;  %2712 = vmatpush.bf16.msrb.mxu2 %v4319_v2  ;;  %v4991_v2 = vld [vmem:[#allocation5 + $0x354] sm:$0xf0] }
 0x168   :  { %2752 = vmatpush.bf16.msra.mxu1 %v4179_v48  ;;  %v4961_v48 = vld [vmem:[#allocation5 + $0x26c] sm:$0xf]  ;;  %v4447_v3 = vor.u32 %v4991_v2, %v4446_v56 }
 0x169   :  { %v4339_v52 = vor.u32 %v4961_v48, %v4336_v49  ;;  %v5013_v2 = vld [vmem:[%s5460_s5 + $0x8] sm:$0xff] }
 0x16b   :  { %2740 = vmatpush.bf16.msra.mxu0 %v4035_v58  ;;  %v1748_v6 = vpop.f32.mrf.mxu0  ;;  %2713 = vmatpush.bf16.msrb.mxu2 %v4303_v4  ;;  %v4999_v58 = vld [vmem:[#allocation5 + $0x394] sm:$0xf0] }
 0x16c   :  { %2753 = vmatpush.bf16.msra.mxu1 %v4163_v25  ;;  %v1761_v7 = vpop.f32.mrf.mxu1  ;;  %v1749_v57 = vadd.f32 %v1748_v6, %v1736_v5  ;;  %v4323_v25 = vor.u32 %v4957_v54, %v4320_v55  ;;  %v4479_v45 = vor.u32 %v4999_v58, %v4478_v42  ;;  %v4987_v4 = vld [vmem:[#allocation5 + $0x334] sm:$0xf0]  ;;  %v5332_v6 = vld [vmem:[%s5459_s4] sm:$0xf] }
 0x16d   :  { %v4431_v5 = vor.u32 %v4987_v4, %v4430_v59  ;;  %v1931_v54 = vperm.slane %v5332_v6, 2  ;;  %v5019_v42 = vld [vmem:[%s5460_s5 + $0x38] sm:$0xff]  ;;  %v1932_v56 = vperm.slane %v5332_v6, 3 }
 0x16e   :  { %2741 = vmatmul.bf16.vlgmr.msra.gmra.mxu0 %v5281_v32  ;;  %v4400_v32 = vld [vmem:[#allocation5 + $0x2f8] sm:$0xf0]  ;;  %v1762_v19 = vadd.f32 %v1761_v7, %v1749_v57  ;;  %v4983_v7 = vld [vmem:[#allocation5 + $0x314] sm:$0xf0]  ;;  %v1929_v57 = vperm.slane %v5332_v6, 0 }
 0x16f   :  { %2754 = vmatmul.bf16.vlgmr.msra.gmra.mxu1 %v5286_v18  ;;  %v4403_v18 = vor.u32 %v4977_v12, %v4400_v32  ;;  %2714 = vmatpush.bf16.msrb.mxu2 %v4287_v13  ;;  %v5009_v12 = vld [vmem:[#allocation5 + $0x3ec] sm:$0xf]  ;;  %v4528_v32 = vld [vmem:[#allocation5 + $0x3f8] sm:$0xf0]  ;;  %v4415_v13 = vor.u32 %v4983_v7, %v4414_v11 }
 0x170   :  { %3053 = vmatpush.bf16.msrb.mxu0 %v5019_v42  ;;  %v5023_v7 = vld [vmem:[%s5460_s5 + $0x58] sm:$0xff]  ;;  %v5036_v42 = vld [vmem:[%s5460_s5 + $0xc0] sm:$0xff] }
 0x172   :  { %2715 = vmatmul.bf16.vlgmr.msrb.gmra.mxu2 %v5314_v21 }
 0x173   :  { %v1774_v20 = vpop.f32.mrf.mxu2  ;;  %2759 = vmatpush.bf16.msra.mxu2 %v4403_v18  ;;  %v1750_v26 = vpop.f32.mrf.mxu0  ;;  %v4531_v18 = vor.u32 %v5009_v12, %v4528_v32  ;;  %v5035_v12 = vld [vmem:[%s5460_s5 + $0xb8] sm:$0xff]  ;;  %v5022_v32 = vld [vmem:[%s5460_s5 + $0x50] sm:$0xff] }
 0x174   :  { %v1775_v14 = vadd.f32 %v1774_v20, %v1762_v19  ;;  %v1787_v22 = vpop.f32.mrf.mxu3  ;;  %v1763_v27 = vpop.f32.mrf.mxu1  ;;  %v5001_v26 = vld [vmem:[#allocation5 + $0x3ac] sm:$0xf]  ;;  %3054 = vmatpush.bf16.msrb.mxu0 %v5018_v8 }
 0x175   :  { %v4997_v27 = vld [vmem:[#allocation5 + $0x38c] sm:$0xf] }
 0x176   :  { %v1788_v29 = vadd.f32 %v1787_v22, %v1775_v14  ;;  %v4515_v14 = vor.u32 %v5005_v23, %v4512_v16  ;;  %v5021_v16 = vld [vmem:[%s5460_s5 + $0x48] sm:$0xff] }
 0x177   :  { %2760 = vmatpush.bf16.msra.mxu2 %v4387_v31  ;;  %v4496_v31 = vld [vmem:[#allocation5 + $0x3b8] sm:$0xf0] }
 0x178   :  { %v1794_v17 = vmax.f32 %v1788_v29, 0.0  ;;  %v4483_v29 = vor.u32 %v4997_v27, %v4480_v28 }
 0x17a   :  { %v5325_v39 = vpack.c.bf16 %v1794_v17, %v1794_v17  ;;  %v1930_v17 = vperm.slane %v5332_v6, 1  ;;  %v5024_v6 = vld [vmem:[%s5460_s5 + $0x60] sm:$0xff] }
 0x17b   :  { %v1776_v33 = vpop.f32.mrf.mxu2  ;;  %2761 = vmatpush.bf16.msra.mxu2 %v4371_v37  ;;  %v4467_v37 = vor.u32 %v4993_v30, %v4464_v36 }
 0x17c   :  { %v1789_v43 = vpop.f32.mrf.mxu3  ;;  %2624 = vmatmul.bf16.vlgmr.msrb.gmra.mxu3 %v5325_v39 }
 0x17d   :  { %2720 = vmatpush.bf16.msrb.mxu3 %v4527_v34  ;;  %v4985_v43 = vld [vmem:[#allocation5 + $0x32c] sm:$0xf] }
 0x17f   :  { %2762 = vmatpush.bf16.msra.mxu2 %v4355_v46  ;;  %v4432_v46 = vld [vmem:[#allocation5 + $0x338] sm:$0xf0] }
 0x180   :  { %v4435_v48 = vor.u32 %v4985_v43, %v4432_v46 }
 0x181   :  { %2721 = vmatpush.bf16.msrb.mxu3 %v4511_v47 }
 0x183   :  { %2763 = vmatpush.bf16.msra.mxu2 %v4339_v52  ;;  %v4419_v52 = vor.u32 %v4981_v40, %v4416_v51  ;;  %v5038_v51 = vld [vmem:[%s5460_s5 + $0xd0] sm:$0xff] }
 0x185   :  { %2722 = vmatpush.bf16.msrb.mxu3 %v4495_v53 }
 0x187   :  { %2764 = vmatpush.bf16.msra.mxu2 %v4323_v25 }
 0x189   :  { %2723 = vmatpush.bf16.msrb.mxu3 %v4479_v45 }
 0x18b   :  { %v2586_v1 = vpop.f32.mrf.mxu0  ;;  %2765 = vmatpush.bf16.msra.mxu2 %v4307_v62  ;;  %v5027_v62 = vld [vmem:[%s5460_s5 + $0x78] sm:$0xff] }
 0x18c   :  { %2676 = vmatmul.bf16.vlgmr.msra.gmra.mxu3 %v5325_v39  ;;  %v2587_v19 = vadd.f32 %v2586_v1, %v1929_v57  ;;  %3066 = vmatpush.bf16.msrb.mxu1 %v5027_v62  ;;  %v5026_v1 = vld [vmem:[%s5460_s5 + $0x70] sm:$0xff] }
 0x18d   :  { %2724 = vmatpush.bf16.msrb.mxu3 %v4463_v63  ;;  %v5015_v63 = vld [vmem:[%s5460_s5 + $0x18] sm:$0xff]  ;;  %v5034_v57 = vld [vmem:[%s5460_s5 + $0xb0] sm:$0xff] }
 0x18f   :  { %2766 = vmatpush.bf16.msra.mxu2 %v4291_v50  ;;  %v5025_v50 = vld [vmem:[%s5460_s5 + $0x68] sm:$0xff] }
 0x190   :  { %3067 = vmatpush.bf16.msrb.mxu1 %v5026_v1 }
 0x191   :  { %2725 = vmatpush.bf16.msrb.mxu3 %v4447_v3 }
 0x192   :  { %2767 = vmatmul.bf16.vlgmr.msra.gmra.mxu2 %v5314_v21  ;;  %v2599_v20 = vpop.f32.mrf.mxu1  ;;  %v4499_v21 = vor.u32 %v5001_v26, %v4496_v31  ;;  %v5032_v26 = vld [vmem:[%s5460_s5 + $0xa0] sm:$0xff]  ;;  %v5031_v31 = vld [vmem:[%s5460_s5 + $0x98] sm:$0xff] }
 0x193   :  { %v2588_v10 = vpop.f32.mrf.mxu0  ;;  %v5336_v22 = vadd.f32 %v2599_v20, %v2587_v19  ;;  %3079 = vmatpush.bf16.msrb.mxu2 %v5035_v12  ;;  %v5033_v19 = vld [vmem:[%s5460_s5 + $0xa8] sm:$0xff] }
 0x194   :  { %3068 = vmatpush.bf16.msrb.mxu1 %v5025_v50  ;;  %v5012_v10 = vld [vmem:[%s5460_s5] sm:$0xff] }
 0x195   :  { %2726 = vmatpush.bf16.msrb.mxu3 %v4431_v5 }
 0x197   :  { %3080 = vmatpush.bf16.msrb.mxu2 %v5034_v57 }
 0x198   :  { %3069 = vmatpush.bf16.msrb.mxu1 %v5024_v6 }
 0x199   :  { %2727 = vmatpush.bf16.msrb.mxu3 %v4415_v13 }
 0x19a   :  { %v2601_v15 = vpop.f32.mrf.mxu1 }
 0x19b   :  { %3081 = vmatpush.bf16.msrb.mxu2 %v5033_v19  ;;  %v5029_v15 = vld [vmem:[%s5460_s5 + $0x88] sm:$0xff] }
 0x19c   :  { %2728 = vmatmul.bf16.vlgmr.msrb.gmra.mxu3 %v5325_v39  ;;  %3070 = vmatpush.bf16.msrb.mxu1 %v5023_v7 }
 0x19d   :  { %2772 = vmatpush.bf16.msra.mxu3 %v4531_v18 }
 0x19f   :  { %3082 = vmatpush.bf16.msrb.mxu2 %v5032_v26 }
 0x1a0   :  { %3071 = vmatpush.bf16.msrb.mxu1 %v5022_v32 }
 0x1a1   :  { %2773 = vmatpush.bf16.msra.mxu3 %v4515_v14  ;;  %v5020_v14 = vld [vmem:[%s5460_s5 + $0x40] sm:$0xff] }
 0x1a3   :  { %3083 = vmatpush.bf16.msrb.mxu2 %v5031_v31 }
 0x1a4   :  { %3072 = vmatpush.bf16.msrb.mxu1 %v5021_v16 }
 0x1a5   :  { %2774 = vmatpush.bf16.msra.mxu3 %v4499_v21  ;;  %v5030_v21 = vld [vmem:[%s5460_s5 + $0x90] sm:$0xff] }
 0x1a7   :  { %3084 = vmatpush.bf16.msrb.mxu2 %v5030_v21 }
 0x1a8   :  { %3073 = vmatpush.bf16.msrb.mxu1 %v5020_v14 }
 0x1a9   :  { %2775 = vmatpush.bf16.msra.mxu3 %v4483_v29 }
 0x1ab   :  { %v2638_v34 = vpop.f32.mrf.mxu0  ;;  %3085 = vmatpush.bf16.msrb.mxu2 %v5029_v15 }
 0x1ac   :  { %v2639_v44 = vadd.f32 %v2638_v34, %v1930_v17  ;;  %v2651_v33 = vpop.f32.mrf.mxu1  ;;  %v5043_v34 = vld [vmem:[%s5460_s5 + $0xf8] sm:$0xff] }
 0x1ad   :  { %2776 = vmatpush.bf16.msra.mxu3 %v4467_v37  ;;  %v5028_v37 = vld [vmem:[%s5460_s5 + $0x80] sm:$0xff] }
 0x1ae   :  { %v5340_v47 = vadd.f32 %v2651_v33, %v2639_v44  ;;  %v5041_v44 = vld [vmem:[%s5460_s5 + $0xe8] sm:$0xff] }
 0x1af   :  { %3086 = vmatpush.bf16.msrb.mxu2 %v5028_v37 }
 0x1b1   :  { %2777 = vmatpush.bf16.msra.mxu3 %v4451_v41  ;;  %v5040_v41 = vld [vmem:[%s5460_s5 + $0xe0] sm:$0xff] }
 0x1b3   :  { %v2640_v49 = vpop.f32.mrf.mxu0 }
 0x1b4   :  { %v2653_v53 = vpop.f32.mrf.mxu1 }
 0x1b5   :  { %2778 = vmatpush.bf16.msra.mxu3 %v4435_v48  ;;  %v5039_v48 = vld [vmem:[%s5460_s5 + $0xd8] sm:$0xff] }
 0x1b9   :  { %2779 = vmatpush.bf16.msra.mxu3 %v4419_v52 }
 0x1bc   :  { %2780 = vmatmul.bf16.vlgmr.msra.gmra.mxu3 %v5325_v39  ;;  %v5017_v39 = vld [vmem:[%s5460_s5 + $0x28] sm:$0xff] }
 0x1bd   :  { %3055 = vmatpush.bf16.msrb.mxu0 %v5017_v39  ;;  %3092 = vmatpush.bf16.msrb.mxu3 %v5043_v34 }
 0x1c1   :  { %3056 = vmatpush.bf16.msrb.mxu0 %v5016_v61 }
 0x1c5   :  { %3057 = vmatpush.bf16.msrb.mxu0 %v5015_v63 }
 0x1c9   :  { %3058 = vmatpush.bf16.msrb.mxu0 %v5014_v0 }
 0x1cb   :  { %v2690_v55 = vpop.f32.mrf.mxu0 }
 0x1cc   :  { %v2691_v58 = vadd.f32 %v2690_v55, %v1931_v54  ;;  %v2703_v25 = vpop.f32.mrf.mxu1 }
 0x1cd   :  { %3059 = vmatpush.bf16.msrb.mxu0 %v5013_v2 }
 0x1ce   :  { %v5347_v45 = vadd.f32 %v2703_v25, %v2691_v58 }
 0x1d1   :  { %3060 = vmatpush.bf16.msrb.mxu0 %v5012_v10 }
 0x1d3   :  { %v2692_v9 = vpop.f32.mrf.mxu0 }
 0x1d4   :  { %v2705_v60 = vpop.f32.mrf.mxu1 }
 0x1d5   :  { %v2612_v24 = vpop.f32.mrf.mxu2 }
 0x1d6   :  { %v2613_v28 = vadd.f32 %v2612_v24, %v5336_v22  ;;  %v5042_v22 = vld [vmem:[%s5460_s5 + $0xf0] sm:$0xff] }
 0x1d7   :  { %3093 = vmatpush.bf16.msrb.mxu3 %v5042_v22 }
 0x1db   :  { %3094 = vmatpush.bf16.msrb.mxu3 %v5041_v44 }
 0x1dd   :  { %v2614_v59 = vpop.f32.mrf.mxu2 }
 0x1de   :  { %v5049_v59 = vld [vmem:[%s5461_s6] ss:$0 sm:$0xff] }
 0x1df   :  { %3095 = vmatpush.bf16.msrb.mxu3 %v5040_v41 }
 0x1e3   :  { %3096 = vmatpush.bf16.msrb.mxu3 %v5039_v48 }
 0x1e5   :  { %v2664_v18 = vpop.f32.mrf.mxu2 }
 0x1e6   :  { %v2665_v33 = vadd.f32 %v2664_v18, %v5340_v47  ;;  %v5037_v47 = vld [vmem:[%s5460_s5 + $0xc8] sm:$0xff] }
 0x1e7   :  { %3097 = vmatpush.bf16.msrb.mxu3 %v5038_v51 }
 0x1eb   :  { %v2742_v3 = vpop.f32.mrf.mxu0  ;;  %3098 = vmatpush.bf16.msrb.mxu3 %v5037_v47 }
 0x1ec   :  { %v2743_v4 = vadd.f32 %v2742_v3, %v1932_v56  ;;  %v2755_v5 = vpop.f32.mrf.mxu1 }
 0x1ed   :  { %v2666_v20 = vpop.f32.mrf.mxu2 }
 0x1ee   :  { %v5383_v11 = vadd.f32 %v2755_v5, %v2743_v4 }
 0x1ef   :  { %3099 = vmatpush.bf16.msrb.mxu3 %v5036_v42 }
 0x1f3   :  { %v2744_v13 = vpop.f32.mrf.mxu0 }
 0x1f4   :  { %v2757_v23 = vpop.f32.mrf.mxu1 }
 0x1f5   :  { %v2716_v27 = vpop.f32.mrf.mxu2 }
 0x1f6   :  { %v2717_v54 = vadd.f32 %v2716_v27, %v5347_v45 }
 0x1fd   :  { %v2718_v36 = vpop.f32.mrf.mxu2 }
 0x1ff   :  { %v2625_v29 = vpop.f32.mrf.mxu3 }
 0x200   :  { %v2626_v30 = vadd.f32 %v2625_v29, %v2613_v28 }
 0x202   :  { %v2785_v17 = vmax.f32 %v2626_v30, 0.0 }
 0x204   :  { %v2789_v35 = vpack.c.bf16 %v2785_v17, %v2785_v17 }
 0x206   :  { %3061 = vmatmul.bf16.vlgmr.msrb.gmra.mxu0 %v2789_v35 }
 0x207   :  { %v2627_v38 = vpop.f32.mrf.mxu3 }
 0x20f   :  { %v2677_v43 = vpop.f32.mrf.mxu3 }
 0x210   :  { %v2678_v46 = vadd.f32 %v2677_v43, %v2665_v33 }
 0x212   :  { %v2786_v49 = vmax.f32 %v2678_v46, 0.0 }
 0x214   :  { %v2790_v40 = vpack.c.bf16 %v2786_v49, %v2786_v49 }
 0x215   :  { %v2768_v52 = vpop.f32.mrf.mxu2 }
 0x216   :  { %3074 = vmatmul.bf16.vlgmr.msrb.gmra.mxu1 %v2790_v40  ;;  %v2769_v60 = vadd.f32 %v2768_v52, %v5383_v11 }
 0x217   :  { %v2679_v53 = vpop.f32.mrf.mxu3 }
 0x21d   :  { %v2770_v55 = vpop.f32.mrf.mxu2 }
 0x21f   :  { %v2729_v58 = vpop.f32.mrf.mxu3 }
 0x220   :  { %v2730_v25 = vadd.f32 %v2729_v58, %v2717_v54 }
 0x222   :  { %v2787_v8 = vmax.f32 %v2730_v25, 0.0 }
 0x224   :  { %v2791_v9 = vpack.c.bf16 %v2787_v8, %v2787_v8 }
 0x226   :  { %3087 = vmatmul.bf16.vlgmr.msrb.gmra.mxu2 %v2791_v9 }
 0x227   :  { %v2731_v39 = vpop.f32.mrf.mxu3 }
 0x23f   :  { %v2781_v61 = vpop.f32.mrf.mxu3 }
 0x240   :  { %v2782_v62 = vadd.f32 %v2781_v61, %v2769_v60 }
 0x242   :  { %v2788_v63 = vmax.f32 %v2782_v62, 0.0 }
 0x244   :  { %v2792_v24 = vpack.c.bf16 %v2788_v63, %v2788_v63 }
 0x246   :  { %3100 = vmatmul.bf16.vlgmr.msrb.gmra.mxu3 %v2792_v24 }
 0x247   :  { %v2783_v45 = vpop.f32.mrf.mxu3 }
 0x283   :  { %v3062_v0 = vpop.f32.mrf.mxu0 }
 0x284   :  { %v3063_v4 = vadd.f32 %v5049_v59, %v3062_v0 }
 0x28b   :  { %v3064_v1 = vpop.f32.mrf.mxu0 }
 0x293   :  { %v3075_v56 = vpop.f32.mrf.mxu1 }
 0x294   :  { %v3076_v5 = vadd.f32 %v3075_v56, %v3063_v4 }
 0x29b   :  { %v3077_v2 = vpop.f32.mrf.mxu1 }
 0x2a9   :  { %v3088_v50 = vpop.f32.mrf.mxu2 }
 0x2aa   :  { %v3089_v10 = vadd.f32 %v3088_v50, %v3076_v5 }
 0x2b1   :  { %v3090_v3 = vpop.f32.mrf.mxu2 }
 0x2c9   :  { %v3101_v6 = vpop.f32.mrf.mxu3 }
 0x2ca   :  { %v3102_v11 = vadd.f32 %v3101_v6, %v3089_v10 }
 0x2cc   :  { %3105 = vst [vmem:[#allocation7] sm:$0xff] %v3102_v11 }
 0x2cd   :  { %3116 = dma.vmem_to_hbm [thread:$0]  %s3112_s13, 128, %s3114_s16, [#allocation4]  }
 0x2d1   :  { %v3103_v7 = vpop.f32.mrf.mxu3 }
 0x2d2   :  { %5127 = dma.done.wait [#allocation4], 128  }
 0x2d3   :  { %5128 = vsyncadd [#allocation4], 4294967168 }
 0x2d4   :  { %3121 = vsyncpa [#allocation3], 1 }
 0x2d5   :  { %3122 = vsyncpa [#allocation6], 1 }
 0x2d6   :  { %3123 = vsyncpa [#allocation4], 1 }

</bundles_post_ra>
